<compile_context>
chip_gen: v5e
topology: v5e:2x2
jax: 0.10.0
libtpu: 0.0.40
codegen_flags: <defaults>
</compile_context>

<pallas_src>
import jax
import jax.numpy as jnp
import numpy as np
from jax.experimental import pallas as pl
from jax.experimental.pallas import tpu as pltpu


def _axial_attention_kernel(qkv_ref, qe_ep_ref, qe_pe_ref, ke_ep_ref,
                            ve_ji_ref, bn2_ref, bn3_ref, o_ref):
    """One (row-block, group) grid step; fused row index n is on the lane axis.

    qkv_ref   : VMEM (2*gc, A, NB)     BN1-folded q/k/v rows of this group
    qe_ep_ref : VMEM (gc//2, A, A, NB) qe[c, pos, emb] laid out [c, emb, pos, n]
    qe_pe_ref : VMEM (gc//2, A, A, NB) qe[c, pos, emb] laid out [c, pos, emb, n]
    ke_ep_ref : VMEM (gc//2, A, A, NB) ke[c, pos, emb] laid out [c, emb, pos, n]
    ve_ji_ref : VMEM (gc,    A, A, NB) ve[c, i, j]     laid out [c, j, i, n]
    bn2_ref   : SMEM (4*G,)            folded similarity-BN (s_qk,s_qe,s_ke,shift)
    bn3_ref   : SMEM (3*Cout,)         folded output-BN (s_att,s_att_emb,shift)
    o_ref     : VMEM (gc, A, NB)       output rows of this group

    Layout convention for every (A, A, NB) intermediate: axis 0 = torch j
    (softmax axis, one vreg slab per j), axis 1 = torch i (sublanes),
    axis 2 = fused row index n (lanes, NB=128 -> every slab is one f32 vreg).
    """
    f32 = jnp.float32
    two_gc, A, NB = qkv_ref.shape
    gc = two_gc // 2
    gc2 = gc // 2
    g = pl.program_id(1)

    # ---- embedded query / key ------------------------------------------------
    #   *_ep[j_emb, i_pos, n] feeds the similarity sum directly.
    #   q_pe [i_pos, j_emb, n] feeds the query_key contraction.
    # All multiplies are full-vreg MACs against the pre-broadcast tables
    # (except the one sublane broadcast per (c, pos) for the _pe layout).
    q_emb_ep = jnp.zeros((A, A, NB), f32)
    k_emb_ep = jnp.zeros((A, A, NB), f32)
    q_emb_pe = jnp.zeros((A, A, NB), f32)
    for c in range(gc2):
        q_c = qkv_ref[c].astype(f32)             # (A_pos, NB)
        k_c = qkv_ref[gc2 + c].astype(f32)
        q_emb_ep = q_emb_ep + q_c[None, :, :] * qe_ep_ref[c]
        k_emb_ep = k_emb_ep + k_c[None, :, :] * ke_ep_ref[c]
        q_emb_pe = q_emb_pe + q_c[:, None, :] * qe_pe_ref[c]

    # ---- query_key[j, i, n] = sum_p k_emb[p, j, n] * q_emb[p, i, n] ----------
    # Accumulated over the position axis p with only an 8-vreg accumulator:
    # the k operand is a sublane broadcast of row p of each j-slab, the q
    # operand is one full vreg replicated across slabs (free).
    qk = jnp.zeros((A, A, NB), f32)
    for p in range(A):
        qk = qk + k_emb_ep[:, p:p + 1, :] * q_emb_pe[p][None, :, :]

    # ---- similarity = BN2d(cat[qk, q_emb, k_emb]) summed over the 3 maps ----
    s_qk = bn2_ref[4 * g + 0]
    s_qe = bn2_ref[4 * g + 1]
    s_ke = bn2_ref[4 * g + 2]
    shift = bn2_ref[4 * g + 3]
    sim = s_qk * qk + s_qe * q_emb_ep + s_ke * k_emb_ep + shift

    # ---- softmax over torch j == axis 0 (pure VPU max/sum of 8 vregs) -------
    # The normalization divide is folded into the output scaling below.
    sim = sim - jnp.max(sim, axis=0, keepdims=True)
    prob = jnp.exp(sim)                                   # unnormalized (A,A,NB)
    inv_denom = pl.reciprocal(jnp.sum(prob, axis=0), approx=False)   # (A_i, NB)

    # ---- attention application + folded output BatchNorm1d + half-sum -------
    for c in range(gc):
        v_c = qkv_ref[2 * gc2 + c].astype(f32)            # (A_j, NB)
        att = jnp.zeros((A, NB), f32)                     # [i_pos, n]
        att_emb = jnp.zeros((A, NB), f32)
        for j in range(A):
            att = att + prob[j] * v_c[j:j + 1, :]         # sublane bcast of v row
            att_emb = att_emb + prob[j] * ve_ji_ref[c, j]  # full-vreg MAC
        base = 3 * (g * gc + c)
        out = (bn3_ref[base + 0] * att + bn3_ref[base + 1] * att_emb) \
            * inv_denom + bn3_ref[base + 2]
        o_ref[c] = out.astype(o_ref.dtype)


def axial_attention_3d(x, params, *, dim, span, groups, block_rows=128,
                       eps=1e-5):
    """Pallas forward of AxialAttention3d (inference-mode BatchNorm)."""
    assert dim in (0, 1, 2)
    w_qkv = params['w_qkv']                       # (2*Cout, Cin)
    two_cout, cin = w_qkv.shape
    cout = two_cout // 2
    G = groups
    assert cout % G == 0
    gc = cout // G
    assert gc % 2 == 0
    gc2 = gc // 2
    A = span

    # ---- dim-dependent permute so the attended axis is last (layout glue) ----
    if dim == 0:
        xp = jnp.transpose(x, (0, 3, 4, 1, 2))
    elif dim == 1:
        xp = jnp.transpose(x, (0, 2, 4, 1, 3))
    else:
        xp = jnp.transpose(x, (0, 2, 3, 1, 4))
    B, d1, d2, cin_chk, a_chk = xp.shape
    assert cin_chk == cin and a_chk == A
    N = B * d1 * d2
    x_rows = xp.reshape(N, cin, A).astype(jnp.float32)

    # ---- fold the three BatchNorms (running-stats / eval mode) ----
    def fold(gamma, beta, mean, var):
        s = gamma / jnp.sqrt(var + eps)
        return s, beta - mean * s

    s1, h1 = fold(*params['bn1'])                 # (2*Cout,)
    s2, h2 = fold(*params['bn2'])                 # (3*G,)
    s3, h3 = fold(*params['bn3'])                 # (2*Cout,)

    w_folded = (w_qkv * s1[:, None]).astype(jnp.float32)   # (2*Cout, Cin)
    b_folded = h1.astype(jnp.float32)                      # (2*Cout,)

    bn2_flat = jnp.stack(
        [s2[:G], s2[G:2 * G], s2[2 * G:],
         h2[:G] + h2[G:2 * G] + h2[2 * G:]],
        axis=1).reshape(-1).astype(jnp.float32)            # (4*G,)
    s3e = s3.reshape(cout, 2)
    h3e = h3.reshape(cout, 2)
    bn3_flat = jnp.stack([s3e[:, 0], s3e[:, 1], h3e[:, 0] + h3e[:, 1]],
                         axis=1).reshape(-1).astype(jnp.float32)   # (3*Cout,)

    # ---- 1x1 qkv projection + folded BN1 on the MXU (single XLA einsum that
    # also produces the lane-dense (O, A, N) layout the kernel consumes) ----
    qkv_lanes = jnp.einsum('oc,nca->oan', w_folded, x_rows,
                           precision=jax.lax.Precision.HIGHEST) \
        + b_folded[:, None, None]                          # (2*Cout, A, N)

    NB = block_rows
    n_pad = -N % NB
    if n_pad:
        qkv_lanes = jnp.pad(qkv_lanes, ((0, 0), (0, 0), (0, n_pad)))
    n_total = N + n_pad
    n_blocks = n_total // NB

    # ---- relative positional embedding gather + lane-dense pre-broadcast ----
    rel = params['rel_emb']                                # (2*gc, 2*span-1)
    idx = (jnp.arange(A)[:, None] - jnp.arange(A)[None, :] + A - 1).reshape(-1)
    emb = jnp.take(rel, idx, axis=1).reshape(2 * gc, A, A).astype(jnp.float32)
    qe, ke, ve = emb[:gc2], emb[gc2:2 * gc2], emb[2 * gc2:]   # [c, pos_i, emb_j]

    def lane_bcast(t):   # (c, a, b) -> (c, a, b, NB) lane-dense static table
        return jnp.broadcast_to(t[..., None], t.shape + (NB,))

    qe_ep = lane_bcast(jnp.transpose(qe, (0, 2, 1)))   # [c, emb, pos, n]
    qe_pe = lane_bcast(qe)                             # [c, pos, emb, n]
    ke_ep = lane_bcast(jnp.transpose(ke, (0, 2, 1)))   # [c, emb, pos, n]
    ve_ji = lane_bcast(jnp.transpose(ve, (0, 2, 1)))   # [c, j,   i,   n]

    const4 = lambda i, g: (0, 0, 0, 0)   # static tables: fetched once

    out_lanes = pl.pallas_call(
        _axial_attention_kernel,
        out_shape=jax.ShapeDtypeStruct((cout, A, n_total), jnp.float32),
        grid_spec=pltpu.PrefetchScalarGridSpec(
            num_scalar_prefetch=0,
            grid=(n_blocks, G),
            in_specs=[
                pl.BlockSpec((2 * gc, A, NB), lambda i, g: (g, 0, i)),
                pl.BlockSpec((gc2, A, A, NB), const4),
                pl.BlockSpec((gc2, A, A, NB), const4),
                pl.BlockSpec((gc2, A, A, NB), const4),
                pl.BlockSpec((gc, A, A, NB), const4),
                pl.BlockSpec(memory_space=pltpu.MemorySpace.SMEM),   # bn2_flat
                pl.BlockSpec(memory_space=pltpu.MemorySpace.SMEM),   # bn3_flat
            ],
            out_specs=pl.BlockSpec((gc, A, NB), lambda i, g: (g, 0, i)),
        ),
        compiler_params=pltpu.CompilerParams(
            dimension_semantics=("parallel", "parallel"),
            vmem_limit_bytes=32 * 1024 * 1024),
    )(qkv_lanes, qe_ep, qe_pe, ke_ep, ve_ji, bn2_flat, bn3_flat)

    # ---- back to [B, Cout, h, w, d] (layout plumbing) ----
    out_rows = jnp.transpose(out_lanes[:, :, :N], (2, 0, 1))   # (N, Cout, A)
    out = out_rows.reshape(B, d1, d2, cout, A)
    if dim == 0:
        out = jnp.transpose(out, (0, 3, 4, 1, 2))
    elif dim == 1:
        out = jnp.transpose(out, (0, 3, 1, 4, 2))
    else:
        out = jnp.transpose(out, (0, 3, 1, 2, 4))
    return out


def axial_attention_3d_ref(x, params, *, dim, span, groups, eps=1e-5):
    """Pure-JAX reference mirroring the PyTorch forward (eval-mode BN)."""
    hp = jax.lax.Precision.HIGHEST
    w_qkv = params['w_qkv']
    g1, b1, m1, v1 = params['bn1']
    g2, b2, m2, v2 = params['bn2']
    g3, b3, m3, v3 = params['bn3']
    rel = params['rel_emb']
    two_cout, cin = w_qkv.shape
    cout = two_cout // 2
    G = groups
    gc = cout // G
    gc2 = gc // 2

    if dim == 0:
        xp = jnp.transpose(x, (0, 3, 4, 1, 2))
    elif dim == 1:
        xp = jnp.transpose(x, (0, 2, 4, 1, 3))
    else:
        xp = jnp.transpose(x, (0, 2, 3, 1, 4))
    B, d1, d2, _, A = xp.shape
    N = B * d1 * d2
    xin = xp.reshape(N, cin, A)

    qkv = jnp.einsum('oc,nca->noa', w_qkv, xin, precision=hp)
    qkv = (qkv - m1[None, :, None]) / jnp.sqrt(v1[None, :, None] + eps) \
        * g1[None, :, None] + b1[None, :, None]
    qkv = qkv.reshape(N, G, 2 * gc, A)
    q = qkv[:, :, :gc2]
    k = qkv[:, :, gc2:2 * gc2]
    v = qkv[:, :, 2 * gc2:]

    idx = (jnp.arange(span)[:, None] - jnp.arange(span)[None, :]
           + span - 1).reshape(-1)
    emb = jnp.take(rel, idx, axis=1).reshape(2 * gc, span, span)
    qe_e, ke_e, ve_e = emb[:gc2], emb[gc2:2 * gc2], emb[2 * gc2:]

    q_emb = jnp.einsum('ngci,cij->ngij', q, qe_e, precision=hp)
    k_emb = jnp.einsum('ngci,cij->ngij', k, ke_e, precision=hp)
    qk = jnp.einsum('ngci,ngcj->ngij', q_emb, k_emb, precision=hp)

    sim = jnp.concatenate([qk, q_emb, k_emb], axis=1)          # (N, 3G, A, A)
    sim = (sim - m2[None, :, None, None]) / jnp.sqrt(v2[None, :, None, None] + eps) \
        * g2[None, :, None, None] + b2[None, :, None, None]
    sim = sim.reshape(N, 3, G, A, A).sum(axis=1)
    sim = jax.nn.softmax(sim, axis=3)

    att = jnp.einsum('ngij,ngcj->ngci', sim, v, precision=hp)
    att_e = jnp.einsum('ngij,cij->ngci', sim, ve_e, precision=hp)
    out = jnp.concatenate([att, att_e], axis=-1).reshape(N, 2 * cout, A)
    out = (out - m3[None, :, None]) / jnp.sqrt(v3[None, :, None] + eps) \
        * g3[None, :, None] + b3[None, :, None]
    out = out.reshape(B, d1, d2, cout, 2, A).sum(axis=-2)
    if dim == 0:
        out = jnp.transpose(out, (0, 3, 4, 1, 2))
    elif dim == 1:
        out = jnp.transpose(out, (0, 3, 1, 4, 2))
    else:
        out = jnp.transpose(out, (0, 3, 1, 2, 4))
    return out


if __name__ == "__main__":
    B = 2
    in_channels = 16
    out_channels = 16
    groups = 4
    span = 8
    dim = 2                         # attention over the depth axis
    H, W_sp, D = 16, 16, 8          # depth == span
    gc = out_channels // groups

    key = jax.random.PRNGKey(0)
    keys = jax.random.split(key, 8)

    def bn_params(k, n):
        k1, k2, k3, k4 = jax.random.split(k, 4)
        gamma = 1.0 + 0.1 * jax.random.normal(k1, (n,), jnp.float32)
        beta = 0.1 * jax.random.normal(k2, (n,), jnp.float32)
        mean = 0.1 * jax.random.normal(k3, (n,), jnp.float32)
        var = 0.5 + jax.random.uniform(k4, (n,), jnp.float32)
        return gamma, beta, mean, var

    x = jax.random.normal(keys[0], (B, in_channels, H, W_sp, D), jnp.float32)
    params = {
        'w_qkv': jax.random.normal(keys[1], (2 * out_channels, in_channels),
                                   jnp.float32) / np.sqrt(in_channels),
        'rel_emb': 0.2 * jax.random.normal(keys[2], (2 * gc, 2 * span - 1),
                                           jnp.float32),
        'bn1': bn_params(keys[3], 2 * out_channels),
        'bn2': bn_params(keys[4], 3 * groups),
        'bn3': bn_params(keys[5], 2 * out_channels),
    }

    out = axial_attention_3d(x, params, dim=dim, span=span, groups=groups)
    out = jax.block_until_ready(out)

    ref = axial_attention_3d_ref(x, params, dim=dim, span=span, groups=groups)
    ref = jax.block_until_ready(ref)

    assert out.shape == (B, out_channels, H, W_sp, D), out.shape
    np.testing.assert_allclose(np.asarray(out), np.asarray(ref),
                               rtol=2e-4, atol=2e-4)
    print("KERNEL_OK")
</pallas_src>

<mosaic_0001>
module attributes {stable_mosaic.version = 11 : i64} {
  func.func @_axial_attention_kernel(%arg0: i32, %arg1: i32, %arg2: memref<8x8x128xf32, #tpu.memory_space<vmem>>, %arg3: memref<2x8x8x128xf32, #tpu.memory_space<vmem>>, %arg4: memref<2x8x8x128xf32, #tpu.memory_space<vmem>>, %arg5: memref<2x8x8x128xf32, #tpu.memory_space<vmem>>, %arg6: memref<4x8x8x128xf32, #tpu.memory_space<vmem>>, %arg7: memref<16xf32, #tpu.memory_space<smem>>, %arg8: memref<48xf32, #tpu.memory_space<smem>>, %arg9: memref<4x8x128xf32, #tpu.memory_space<vmem>>) attributes {dimension_semantics = [#tpu.dimension_semantics<parallel>, #tpu.dimension_semantics<parallel>], iteration_bounds = array<i64: 4, 4>, scalar_prefetch = 0 : i64, scratch_operands = 0 : i64, tpu.core_type = #tpu.core_type<tc>, window_params = [{transform_indices = @transform_0, window_bounds = array<i64: 8, 8, 128>}, {pipeline_mode = #tpu.pipeline_mode<synchronous>, transform_indices = @transform_1, window_bounds = array<i64: 2, 8, 8, 128>}, {pipeline_mode = #tpu.pipeline_mode<synchronous>, transform_indices = @transform_2, window_bounds = array<i64: 2, 8, 8, 128>}, {pipeline_mode = #tpu.pipeline_mode<synchronous>, transform_indices = @transform_3, window_bounds = array<i64: 2, 8, 8, 128>}, {pipeline_mode = #tpu.pipeline_mode<synchronous>, transform_indices = @transform_4, window_bounds = array<i64: 4, 8, 8, 128>}, {transform_indices = @transform_5, window_bounds = array<i64: 16>}, {transform_indices = @transform_6, window_bounds = array<i64: 48>}, {transform_indices = @transform_7, window_bounds = array<i64: 4, 8, 128>}]} {
    %cst = arith.constant 0.000000e+00 : f32
    %0 = vector.broadcast %cst : f32 to vector<8x8x128xf32>
    %cst_0 = arith.constant 0.000000e+00 : f32
    %1 = vector.broadcast %cst_0 : f32 to vector<8x8x128xf32>
    %cst_1 = arith.constant 0.000000e+00 : f32
    %2 = vector.broadcast %cst_1 : f32 to vector<8x8x128xf32>
    %c0 = arith.constant 0 : index
    %c0_2 = arith.constant 0 : index
    %c0_3 = arith.constant 0 : index
    %3 = vector.load %arg2[%c0, %c0_2, %c0_3] : memref<8x8x128xf32, #tpu.memory_space<vmem>>, vector<1x8x128xf32>
    %4 = vector.shape_cast %3 : vector<1x8x128xf32> to vector<8x128xf32>
    %c2 = arith.constant 2 : index
    %c0_4 = arith.constant 0 : index
    %c0_5 = arith.constant 0 : index
    %5 = vector.load %arg2[%c2, %c0_4, %c0_5] : memref<8x8x128xf32, #tpu.memory_space<vmem>>, vector<1x8x128xf32>
    %6 = vector.shape_cast %5 : vector<1x8x128xf32> to vector<8x128xf32>
    %7 = vector.shape_cast %4 : vector<8x128xf32> to vector<1x8x128xf32>
    %c0_6 = arith.constant 0 : index
    %c0_7 = arith.constant 0 : index
    %c0_8 = arith.constant 0 : index
    %c0_9 = arith.constant 0 : index
    %8 = vector.load %arg3[%c0_6, %c0_7, %c0_8, %c0_9] : memref<2x8x8x128xf32, #tpu.memory_space<vmem>>, vector<1x8x8x128xf32>
    %9 = vector.shape_cast %8 : vector<1x8x8x128xf32> to vector<8x8x128xf32>
    %10 = vector.broadcast %7 : vector<1x8x128xf32> to vector<8x8x128xf32>
    %11 = arith.mulf %10, %9 : vector<8x8x128xf32>
    %12 = arith.addf %0, %11 : vector<8x8x128xf32>
    %13 = vector.shape_cast %6 : vector<8x128xf32> to vector<1x8x128xf32>
    %c0_10 = arith.constant 0 : index
    %c0_11 = arith.constant 0 : index
    %c0_12 = arith.constant 0 : index
    %c0_13 = arith.constant 0 : index
    %14 = vector.load %arg5[%c0_10, %c0_11, %c0_12, %c0_13] : memref<2x8x8x128xf32, #tpu.memory_space<vmem>>, vector<1x8x8x128xf32>
    %15 = vector.shape_cast %14 : vector<1x8x8x128xf32> to vector<8x8x128xf32>
    %16 = vector.broadcast %13 : vector<1x8x128xf32> to vector<8x8x128xf32>
    %17 = arith.mulf %16, %15 : vector<8x8x128xf32>
    %18 = arith.addf %1, %17 : vector<8x8x128xf32>
    %19 = vector.shape_cast %4 : vector<8x128xf32> to vector<8x1x128xf32>
    %c0_14 = arith.constant 0 : index
    %c0_15 = arith.constant 0 : index
    %c0_16 = arith.constant 0 : index
    %c0_17 = arith.constant 0 : index
    %20 = vector.load %arg4[%c0_14, %c0_15, %c0_16, %c0_17] : memref<2x8x8x128xf32, #tpu.memory_space<vmem>>, vector<1x8x8x128xf32>
    %21 = vector.shape_cast %20 : vector<1x8x8x128xf32> to vector<8x8x128xf32>
    %22 = vector.broadcast %19 : vector<8x1x128xf32> to vector<8x8x128xf32>
    %23 = arith.mulf %22, %21 : vector<8x8x128xf32>
    %24 = arith.addf %2, %23 : vector<8x8x128xf32>
    %c1 = arith.constant 1 : index
    %c0_18 = arith.constant 0 : index
    %c0_19 = arith.constant 0 : index
    %25 = vector.load %arg2[%c1, %c0_18, %c0_19] : memref<8x8x128xf32, #tpu.memory_space<vmem>>, vector<1x8x128xf32>
    %26 = vector.shape_cast %25 : vector<1x8x128xf32> to vector<8x128xf32>
    %c3 = arith.constant 3 : index
    %c0_20 = arith.constant 0 : index
    %c0_21 = arith.constant 0 : index
    %27 = vector.load %arg2[%c3, %c0_20, %c0_21] : memref<8x8x128xf32, #tpu.memory_space<vmem>>, vector<1x8x128xf32>
    %28 = vector.shape_cast %27 : vector<1x8x128xf32> to vector<8x128xf32>
    %29 = vector.shape_cast %26 : vector<8x128xf32> to vector<1x8x128xf32>
    %c1_22 = arith.constant 1 : index
    %c0_23 = arith.constant 0 : index
    %c0_24 = arith.constant 0 : index
    %c0_25 = arith.constant 0 : index
    %30 = vector.load %arg3[%c1_22, %c0_23, %c0_24, %c0_25] : memref<2x8x8x128xf32, #tpu.memory_space<vmem>>, vector<1x8x8x128xf32>
    %31 = vector.shape_cast %30 : vector<1x8x8x128xf32> to vector<8x8x128xf32>
    %32 = vector.broadcast %29 : vector<1x8x128xf32> to vector<8x8x128xf32>
    %33 = arith.mulf %32, %31 : vector<8x8x128xf32>
    %34 = arith.addf %12, %33 : vector<8x8x128xf32>
    %35 = vector.shape_cast %28 : vector<8x128xf32> to vector<1x8x128xf32>
    %c1_26 = arith.constant 1 : index
    %c0_27 = arith.constant 0 : index
    %c0_28 = arith.constant 0 : index
    %c0_29 = arith.constant 0 : index
    %36 = vector.load %arg5[%c1_26, %c0_27, %c0_28, %c0_29] : memref<2x8x8x128xf32, #tpu.memory_space<vmem>>, vector<1x8x8x128xf32>
    %37 = vector.shape_cast %36 : vector<1x8x8x128xf32> to vector<8x8x128xf32>
    %38 = vector.broadcast %35 : vector<1x8x128xf32> to vector<8x8x128xf32>
    %39 = arith.mulf %38, %37 : vector<8x8x128xf32>
    %40 = arith.addf %18, %39 : vector<8x8x128xf32>
    %41 = vector.shape_cast %26 : vector<8x128xf32> to vector<8x1x128xf32>
    %c1_30 = arith.constant 1 : index
    %c0_31 = arith.constant 0 : index
    %c0_32 = arith.constant 0 : index
    %c0_33 = arith.constant 0 : index
    %42 = vector.load %arg4[%c1_30, %c0_31, %c0_32, %c0_33] : memref<2x8x8x128xf32, #tpu.memory_space<vmem>>, vector<1x8x8x128xf32>
    %43 = vector.shape_cast %42 : vector<1x8x8x128xf32> to vector<8x8x128xf32>
    %44 = vector.broadcast %41 : vector<8x1x128xf32> to vector<8x8x128xf32>
    %45 = arith.mulf %44, %43 : vector<8x8x128xf32>
    %46 = arith.addf %24, %45 : vector<8x8x128xf32>
    %cst_34 = arith.constant 0.000000e+00 : f32
    %47 = vector.broadcast %cst_34 : f32 to vector<8x8x128xf32>
    %48 = vector.extract_strided_slice %40 {offsets = [0, 0, 0], sizes = [8, 1, 128], strides = [1, 1, 1]} : vector<8x8x128xf32> to vector<8x1x128xf32>
    %49 = vector.extract_strided_slice %46 {offsets = [0, 0, 0], sizes = [1, 8, 128], strides = [1, 1, 1]} : vector<8x8x128xf32> to vector<1x8x128xf32>
    %50 = vector.shape_cast %49 : vector<1x8x128xf32> to vector<8x128xf32>
    %51 = vector.shape_cast %50 : vector<8x128xf32> to vector<1x8x128xf32>
    %52 = vector.broadcast %48 : vector<8x1x128xf32> to vector<8x8x128xf32>
    %53 = vector.broadcast %51 : vector<1x8x128xf32> to vector<8x8x128xf32>
    %54 = arith.mulf %52, %53 : vector<8x8x128xf32>
    %55 = arith.addf %47, %54 : vector<8x8x128xf32>
    %56 = vector.extract_strided_slice %40 {offsets = [0, 1, 0], sizes = [8, 1, 128], strides = [1, 1, 1]} : vector<8x8x128xf32> to vector<8x1x128xf32>
    %57 = vector.extract_strided_slice %46 {offsets = [1, 0, 0], sizes = [1, 8, 128], strides = [1, 1, 1]} : vector<8x8x128xf32> to vector<1x8x128xf32>
    %58 = vector.shape_cast %57 : vector<1x8x128xf32> to vector<8x128xf32>
    %59 = vector.shape_cast %58 : vector<8x128xf32> to vector<1x8x128xf32>
    %60 = vector.broadcast %56 : vector<8x1x128xf32> to vector<8x8x128xf32>
    %61 = vector.broadcast %59 : vector<1x8x128xf32> to vector<8x8x128xf32>
    %62 = arith.mulf %60, %61 : vector<8x8x128xf32>
    %63 = arith.addf %55, %62 : vector<8x8x128xf32>
    %64 = vector.extract_strided_slice %40 {offsets = [0, 2, 0], sizes = [8, 1, 128], strides = [1, 1, 1]} : vector<8x8x128xf32> to vector<8x1x128xf32>
    %65 = vector.extract_strided_slice %46 {offsets = [2, 0, 0], sizes = [1, 8, 128], strides = [1, 1, 1]} : vector<8x8x128xf32> to vector<1x8x128xf32>
    %66 = vector.shape_cast %65 : vector<1x8x128xf32> to vector<8x128xf32>
    %67 = vector.shape_cast %66 : vector<8x128xf32> to vector<1x8x128xf32>
    %68 = vector.broadcast %64 : vector<8x1x128xf32> to vector<8x8x128xf32>
    %69 = vector.broadcast %67 : vector<1x8x128xf32> to vector<8x8x128xf32>
    %70 = arith.mulf %68, %69 : vector<8x8x128xf32>
    %71 = arith.addf %63, %70 : vector<8x8x128xf32>
    %72 = vector.extract_strided_slice %40 {offsets = [0, 3, 0], sizes = [8, 1, 128], strides = [1, 1, 1]} : vector<8x8x128xf32> to vector<8x1x128xf32>
    %73 = vector.extract_strided_slice %46 {offsets = [3, 0, 0], sizes = [1, 8, 128], strides = [1, 1, 1]} : vector<8x8x128xf32> to vector<1x8x128xf32>
    %74 = vector.shape_cast %73 : vector<1x8x128xf32> to vector<8x128xf32>
    %75 = vector.shape_cast %74 : vector<8x128xf32> to vector<1x8x128xf32>
    %76 = vector.broadcast %72 : vector<8x1x128xf32> to vector<8x8x128xf32>
    %77 = vector.broadcast %75 : vector<1x8x128xf32> to vector<8x8x128xf32>
    %78 = arith.mulf %76, %77 : vector<8x8x128xf32>
    %79 = arith.addf %71, %78 : vector<8x8x128xf32>
    %80 = vector.extract_strided_slice %40 {offsets = [0, 4, 0], sizes = [8, 1, 128], strides = [1, 1, 1]} : vector<8x8x128xf32> to vector<8x1x128xf32>
    %81 = vector.extract_strided_slice %46 {offsets = [4, 0, 0], sizes = [1, 8, 128], strides = [1, 1, 1]} : vector<8x8x128xf32> to vector<1x8x128xf32>
    %82 = vector.shape_cast %81 : vector<1x8x128xf32> to vector<8x128xf32>
    %83 = vector.shape_cast %82 : vector<8x128xf32> to vector<1x8x128xf32>
    %84 = vector.broadcast %80 : vector<8x1x128xf32> to vector<8x8x128xf32>
    %85 = vector.broadcast %83 : vector<1x8x128xf32> to vector<8x8x128xf32>
    %86 = arith.mulf %84, %85 : vector<8x8x128xf32>
    %87 = arith.addf %79, %86 : vector<8x8x128xf32>
    %88 = vector.extract_strided_slice %40 {offsets = [0, 5, 0], sizes = [8, 1, 128], strides = [1, 1, 1]} : vector<8x8x128xf32> to vector<8x1x128xf32>
    %89 = vector.extract_strided_slice %46 {offsets = [5, 0, 0], sizes = [1, 8, 128], strides = [1, 1, 1]} : vector<8x8x128xf32> to vector<1x8x128xf32>
    %90 = vector.shape_cast %89 : vector<1x8x128xf32> to vector<8x128xf32>
    %91 = vector.shape_cast %90 : vector<8x128xf32> to vector<1x8x128xf32>
    %92 = vector.broadcast %88 : vector<8x1x128xf32> to vector<8x8x128xf32>
    %93 = vector.broadcast %91 : vector<1x8x128xf32> to vector<8x8x128xf32>
    %94 = arith.mulf %92, %93 : vector<8x8x128xf32>
    %95 = arith.addf %87, %94 : vector<8x8x128xf32>
    %96 = vector.extract_strided_slice %40 {offsets = [0, 6, 0], sizes = [8, 1, 128], strides = [1, 1, 1]} : vector<8x8x128xf32> to vector<8x1x128xf32>
    %97 = vector.extract_strided_slice %46 {offsets = [6, 0, 0], sizes = [1, 8, 128], strides = [1, 1, 1]} : vector<8x8x128xf32> to vector<1x8x128xf32>
    %98 = vector.shape_cast %97 : vector<1x8x128xf32> to vector<8x128xf32>
    %99 = vector.shape_cast %98 : vector<8x128xf32> to vector<1x8x128xf32>
    %100 = vector.broadcast %96 : vector<8x1x128xf32> to vector<8x8x128xf32>
    %101 = vector.broadcast %99 : vector<1x8x128xf32> to vector<8x8x128xf32>
    %102 = arith.mulf %100, %101 : vector<8x8x128xf32>
    %103 = arith.addf %95, %102 : vector<8x8x128xf32>
    %104 = vector.extract_strided_slice %40 {offsets = [0, 7, 0], sizes = [8, 1, 128], strides = [1, 1, 1]} : vector<8x8x128xf32> to vector<8x1x128xf32>
    %105 = vector.extract_strided_slice %46 {offsets = [7, 0, 0], sizes = [1, 8, 128], strides = [1, 1, 1]} : vector<8x8x128xf32> to vector<1x8x128xf32>
    %106 = vector.shape_cast %105 : vector<1x8x128xf32> to vector<8x128xf32>
    %107 = vector.shape_cast %106 : vector<8x128xf32> to vector<1x8x128xf32>
    %108 = vector.broadcast %104 : vector<8x1x128xf32> to vector<8x8x128xf32>
    %109 = vector.broadcast %107 : vector<1x8x128xf32> to vector<8x8x128xf32>
    %110 = arith.mulf %108, %109 : vector<8x8x128xf32>
    %111 = arith.addf %103, %110 : vector<8x8x128xf32>
    %c4_i32 = arith.constant 4 : i32
    %112 = arith.muli %c4_i32, %arg1 : i32
    %c0_i32 = arith.constant 0 : i32
    %113 = arith.addi %112, %c0_i32 : i32
    %114 = arith.index_cast %113 : i32 to index
    %115 = memref.load %arg7[%114] : memref<16xf32, #tpu.memory_space<smem>>
    %c4_i32_35 = arith.constant 4 : i32
    %116 = arith.muli %c4_i32_35, %arg1 : i32
    %c1_i32 = arith.constant 1 : i32
    %117 = arith.addi %116, %c1_i32 : i32
    %118 = arith.index_cast %117 : i32 to index
    %119 = memref.load %arg7[%118] : memref<16xf32, #tpu.memory_space<smem>>
    %c4_i32_36 = arith.constant 4 : i32
    %120 = arith.muli %c4_i32_36, %arg1 : i32
    %c2_i32 = arith.constant 2 : i32
    %121 = arith.addi %120, %c2_i32 : i32
    %122 = arith.index_cast %121 : i32 to index
    %123 = memref.load %arg7[%122] : memref<16xf32, #tpu.memory_space<smem>>
    %c4_i32_37 = arith.constant 4 : i32
    %124 = arith.muli %c4_i32_37, %arg1 : i32
    %c3_i32 = arith.constant 3 : i32
    %125 = arith.addi %124, %c3_i32 : i32
    %126 = arith.index_cast %125 : i32 to index
    %127 = memref.load %arg7[%126] : memref<16xf32, #tpu.memory_space<smem>>
    %128 = vector.broadcast %115 : f32 to vector<8x8x128xf32>
    %129 = arith.mulf %128, %111 : vector<8x8x128xf32>
    %130 = vector.broadcast %119 : f32 to vector<8x8x128xf32>
    %131 = arith.mulf %130, %34 : vector<8x8x128xf32>
    %132 = arith.addf %129, %131 : vector<8x8x128xf32>
    %133 = vector.broadcast %123 : f32 to vector<8x8x128xf32>
    %134 = arith.mulf %133, %40 : vector<8x8x128xf32>
    %135 = arith.addf %132, %134 : vector<8x8x128xf32>
    %136 = vector.broadcast %127 : f32 to vector<8x8x128xf32>
    %137 = arith.addf %135, %136 : vector<8x8x128xf32>
    %cst_38 = arith.constant dense<0xFF800000> : vector<8x128xf32>
    %138 = vector.multi_reduction <maximumf>, %137, %cst_38 [0] : vector<8x8x128xf32> to vector<8x128xf32>
    %139 = vector.shape_cast %138 : vector<8x128xf32> to vector<1x8x128xf32>
    %140 = vector.broadcast %139 : vector<1x8x128xf32> to vector<8x8x128xf32>
    %141 = arith.subf %137, %140 : vector<8x8x128xf32>
    %142 = math.exp %141 : vector<8x8x128xf32>
    %cst_39 = arith.constant dense<0.000000e+00> : vector<8x128xf32>
    %143 = vector.multi_reduction <add>, %142, %cst_39 [0] : vector<8x8x128xf32> to vector<8x128xf32>
    %144 = tpu.reciprocal %143 : vector<8x128xf32> -> vector<8x128xf32>
    %c4 = arith.constant 4 : index
    %c0_40 = arith.constant 0 : index
    %c0_41 = arith.constant 0 : index
    %145 = vector.load %arg2[%c4, %c0_40, %c0_41] : memref<8x8x128xf32, #tpu.memory_space<vmem>>, vector<1x8x128xf32>
    %146 = vector.shape_cast %145 : vector<1x8x128xf32> to vector<8x128xf32>
    %cst_42 = arith.constant 0.000000e+00 : f32
    %147 = vector.broadcast %cst_42 : f32 to vector<8x128xf32>
    %cst_43 = arith.constant 0.000000e+00 : f32
    %148 = vector.broadcast %cst_43 : f32 to vector<8x128xf32>
    %149 = vector.extract_strided_slice %142 {offsets = [0, 0, 0], sizes = [1, 8, 128], strides = [1, 1, 1]} : vector<8x8x128xf32> to vector<1x8x128xf32>
    %150 = vector.shape_cast %149 : vector<1x8x128xf32> to vector<8x128xf32>
    %151 = vector.extract_strided_slice %146 {offsets = [0, 0], sizes = [1, 128], strides = [1, 1]} : vector<8x128xf32> to vector<1x128xf32>
    %152 = vector.broadcast %151 : vector<1x128xf32> to vector<8x128xf32>
    %153 = arith.mulf %150, %152 : vector<8x128xf32>
    %154 = arith.addf %147, %153 : vector<8x128xf32>
    %155 = vector.extract_strided_slice %142 {offsets = [0, 0, 0], sizes = [1, 8, 128], strides = [1, 1, 1]} : vector<8x8x128xf32> to vector<1x8x128xf32>
    %156 = vector.shape_cast %155 : vector<1x8x128xf32> to vector<8x128xf32>
    %c0_44 = arith.constant 0 : index
    %c0_45 = arith.constant 0 : index
    %c0_46 = arith.constant 0 : index
    %c0_47 = arith.constant 0 : index
    %157 = vector.load %arg6[%c0_44, %c0_45, %c0_46, %c0_47] : memref<4x8x8x128xf32, #tpu.memory_space<vmem>>, vector<1x1x8x128xf32>
    %158 = vector.shape_cast %157 : vector<1x1x8x128xf32> to vector<8x128xf32>
    %159 = arith.mulf %156, %158 : vector<8x128xf32>
    %160 = arith.addf %148, %159 : vector<8x128xf32>
    %161 = vector.extract_strided_slice %142 {offsets = [1, 0, 0], sizes = [1, 8, 128], strides = [1, 1, 1]} : vector<8x8x128xf32> to vector<1x8x128xf32>
    %162 = vector.shape_cast %161 : vector<1x8x128xf32> to vector<8x128xf32>
    %163 = vector.extract_strided_slice %146 {offsets = [1, 0], sizes = [1, 128], strides = [1, 1]} : vector<8x128xf32> to vector<1x128xf32>
    %164 = vector.broadcast %163 : vector<1x128xf32> to vector<8x128xf32>
    %165 = arith.mulf %162, %164 : vector<8x128xf32>
    %166 = arith.addf %154, %165 : vector<8x128xf32>
    %167 = vector.extract_strided_slice %142 {offsets = [1, 0, 0], sizes = [1, 8, 128], strides = [1, 1, 1]} : vector<8x8x128xf32> to vector<1x8x128xf32>
    %168 = vector.shape_cast %167 : vector<1x8x128xf32> to vector<8x128xf32>
    %c0_48 = arith.constant 0 : index
    %c1_49 = arith.constant 1 : index
    %c0_50 = arith.constant 0 : index
    %c0_51 = arith.constant 0 : index
    %169 = vector.load %arg6[%c0_48, %c1_49, %c0_50, %c0_51] : memref<4x8x8x128xf32, #tpu.memory_space<vmem>>, vector<1x1x8x128xf32>
    %170 = vector.shape_cast %169 : vector<1x1x8x128xf32> to vector<8x128xf32>
    %171 = arith.mulf %168, %170 : vector<8x128xf32>
    %172 = arith.addf %160, %171 : vector<8x128xf32>
    %173 = vector.extract_strided_slice %142 {offsets = [2, 0, 0], sizes = [1, 8, 128], strides = [1, 1, 1]} : vector<8x8x128xf32> to vector<1x8x128xf32>
    %174 = vector.shape_cast %173 : vector<1x8x128xf32> to vector<8x128xf32>
    %175 = vector.extract_strided_slice %146 {offsets = [2, 0], sizes = [1, 128], strides = [1, 1]} : vector<8x128xf32> to vector<1x128xf32>
    %176 = vector.broadcast %175 : vector<1x128xf32> to vector<8x128xf32>
    %177 = arith.mulf %174, %176 : vector<8x128xf32>
    %178 = arith.addf %166, %177 : vector<8x128xf32>
    %179 = vector.extract_strided_slice %142 {offsets = [2, 0, 0], sizes = [1, 8, 128], strides = [1, 1, 1]} : vector<8x8x128xf32> to vector<1x8x128xf32>
    %180 = vector.shape_cast %179 : vector<1x8x128xf32> to vector<8x128xf32>
    %c0_52 = arith.constant 0 : index
    %c2_53 = arith.constant 2 : index
    %c0_54 = arith.constant 0 : index
    %c0_55 = arith.constant 0 : index
    %181 = vector.load %arg6[%c0_52, %c2_53, %c0_54, %c0_55] : memref<4x8x8x128xf32, #tpu.memory_space<vmem>>, vector<1x1x8x128xf32>
    %182 = vector.shape_cast %181 : vector<1x1x8x128xf32> to vector<8x128xf32>
    %183 = arith.mulf %180, %182 : vector<8x128xf32>
    %184 = arith.addf %172, %183 : vector<8x128xf32>
    %185 = vector.extract_strided_slice %142 {offsets = [3, 0, 0], sizes = [1, 8, 128], strides = [1, 1, 1]} : vector<8x8x128xf32> to vector<1x8x128xf32>
    %186 = vector.shape_cast %185 : vector<1x8x128xf32> to vector<8x128xf32>
    %187 = vector.extract_strided_slice %146 {offsets = [3, 0], sizes = [1, 128], strides = [1, 1]} : vector<8x128xf32> to vector<1x128xf32>
    %188 = vector.broadcast %187 : vector<1x128xf32> to vector<8x128xf32>
    %189 = arith.mulf %186, %188 : vector<8x128xf32>
    %190 = arith.addf %178, %189 : vector<8x128xf32>
    %191 = vector.extract_strided_slice %142 {offsets = [3, 0, 0], sizes = [1, 8, 128], strides = [1, 1, 1]} : vector<8x8x128xf32> to vector<1x8x128xf32>
    %192 = vector.shape_cast %191 : vector<1x8x128xf32> to vector<8x128xf32>
    %c0_56 = arith.constant 0 : index
    %c3_57 = arith.constant 3 : index
    %c0_58 = arith.constant 0 : index
    %c0_59 = arith.constant 0 : index
    %193 = vector.load %arg6[%c0_56, %c3_57, %c0_58, %c0_59] : memref<4x8x8x128xf32, #tpu.memory_space<vmem>>, vector<1x1x8x128xf32>
    %194 = vector.shape_cast %193 : vector<1x1x8x128xf32> to vector<8x128xf32>
    %195 = arith.mulf %192, %194 : vector<8x128xf32>
    %196 = arith.addf %184, %195 : vector<8x128xf32>
    %197 = vector.extract_strided_slice %142 {offsets = [4, 0, 0], sizes = [1, 8, 128], strides = [1, 1, 1]} : vector<8x8x128xf32> to vector<1x8x128xf32>
    %198 = vector.shape_cast %197 : vector<1x8x128xf32> to vector<8x128xf32>
    %199 = vector.extract_strided_slice %146 {offsets = [4, 0], sizes = [1, 128], strides = [1, 1]} : vector<8x128xf32> to vector<1x128xf32>
    %200 = vector.broadcast %199 : vector<1x128xf32> to vector<8x128xf32>
    %201 = arith.mulf %198, %200 : vector<8x128xf32>
    %202 = arith.addf %190, %201 : vector<8x128xf32>
    %203 = vector.extract_strided_slice %142 {offsets = [4, 0, 0], sizes = [1, 8, 128], strides = [1, 1, 1]} : vector<8x8x128xf32> to vector<1x8x128xf32>
    %204 = vector.shape_cast %203 : vector<1x8x128xf32> to vector<8x128xf32>
    %c0_60 = arith.constant 0 : index
    %c4_61 = arith.constant 4 : index
    %c0_62 = arith.constant 0 : index
    %c0_63 = arith.constant 0 : index
    %205 = vector.load %arg6[%c0_60, %c4_61, %c0_62, %c0_63] : memref<4x8x8x128xf32, #tpu.memory_space<vmem>>, vector<1x1x8x128xf32>
    %206 = vector.shape_cast %205 : vector<1x1x8x128xf32> to vector<8x128xf32>
    %207 = arith.mulf %204, %206 : vector<8x128xf32>
    %208 = arith.addf %196, %207 : vector<8x128xf32>
    %209 = vector.extract_strided_slice %142 {offsets = [5, 0, 0], sizes = [1, 8, 128], strides = [1, 1, 1]} : vector<8x8x128xf32> to vector<1x8x128xf32>
    %210 = vector.shape_cast %209 : vector<1x8x128xf32> to vector<8x128xf32>
    %211 = vector.extract_strided_slice %146 {offsets = [5, 0], sizes = [1, 128], strides = [1, 1]} : vector<8x128xf32> to vector<1x128xf32>
    %212 = vector.broadcast %211 : vector<1x128xf32> to vector<8x128xf32>
    %213 = arith.mulf %210, %212 : vector<8x128xf32>
    %214 = arith.addf %202, %213 : vector<8x128xf32>
    %215 = vector.extract_strided_slice %142 {offsets = [5, 0, 0], sizes = [1, 8, 128], strides = [1, 1, 1]} : vector<8x8x128xf32> to vector<1x8x128xf32>
    %216 = vector.shape_cast %215 : vector<1x8x128xf32> to vector<8x128xf32>
    %c0_64 = arith.constant 0 : index
    %c5 = arith.constant 5 : index
    %c0_65 = arith.constant 0 : index
    %c0_66 = arith.constant 0 : index
    %217 = vector.load %arg6[%c0_64, %c5, %c0_65, %c0_66] : memref<4x8x8x128xf32, #tpu.memory_space<vmem>>, vector<1x1x8x128xf32>
    %218 = vector.shape_cast %217 : vector<1x1x8x128xf32> to vector<8x128xf32>
    %219 = arith.mulf %216, %218 : vector<8x128xf32>
    %220 = arith.addf %208, %219 : vector<8x128xf32>
    %221 = vector.extract_strided_slice %142 {offsets = [6, 0, 0], sizes = [1, 8, 128], strides = [1, 1, 1]} : vector<8x8x128xf32> to vector<1x8x128xf32>
    %222 = vector.shape_cast %221 : vector<1x8x128xf32> to vector<8x128xf32>
    %223 = vector.extract_strided_slice %146 {offsets = [6, 0], sizes = [1, 128], strides = [1, 1]} : vector<8x128xf32> to vector<1x128xf32>
    %224 = vector.broadcast %223 : vector<1x128xf32> to vector<8x128xf32>
    %225 = arith.mulf %222, %224 : vector<8x128xf32>
    %226 = arith.addf %214, %225 : vector<8x128xf32>
    %227 = vector.extract_strided_slice %142 {offsets = [6, 0, 0], sizes = [1, 8, 128], strides = [1, 1, 1]} : vector<8x8x128xf32> to vector<1x8x128xf32>
    %228 = vector.shape_cast %227 : vector<1x8x128xf32> to vector<8x128xf32>
    %c0_67 = arith.constant 0 : index
    %c6 = arith.constant 6 : index
    %c0_68 = arith.constant 0 : index
    %c0_69 = arith.constant 0 : index
    %229 = vector.load %arg6[%c0_67, %c6, %c0_68, %c0_69] : memref<4x8x8x128xf32, #tpu.memory_space<vmem>>, vector<1x1x8x128xf32>
    %230 = vector.shape_cast %229 : vector<1x1x8x128xf32> to vector<8x128xf32>
    %231 = arith.mulf %228, %230 : vector<8x128xf32>
    %232 = arith.addf %220, %231 : vector<8x128xf32>
    %233 = vector.extract_strided_slice %142 {offsets = [7, 0, 0], sizes = [1, 8, 128], strides = [1, 1, 1]} : vector<8x8x128xf32> to vector<1x8x128xf32>
    %234 = vector.shape_cast %233 : vector<1x8x128xf32> to vector<8x128xf32>
    %235 = vector.extract_strided_slice %146 {offsets = [7, 0], sizes = [1, 128], strides = [1, 1]} : vector<8x128xf32> to vector<1x128xf32>
    %236 = vector.broadcast %235 : vector<1x128xf32> to vector<8x128xf32>
    %237 = arith.mulf %234, %236 : vector<8x128xf32>
    %238 = arith.addf %226, %237 : vector<8x128xf32>
    %239 = vector.extract_strided_slice %142 {offsets = [7, 0, 0], sizes = [1, 8, 128], strides = [1, 1, 1]} : vector<8x8x128xf32> to vector<1x8x128xf32>
    %240 = vector.shape_cast %239 : vector<1x8x128xf32> to vector<8x128xf32>
    %c0_70 = arith.constant 0 : index
    %c7 = arith.constant 7 : index
    %c0_71 = arith.constant 0 : index
    %c0_72 = arith.constant 0 : index
    %241 = vector.load %arg6[%c0_70, %c7, %c0_71, %c0_72] : memref<4x8x8x128xf32, #tpu.memory_space<vmem>>, vector<1x1x8x128xf32>
    %242 = vector.shape_cast %241 : vector<1x1x8x128xf32> to vector<8x128xf32>
    %243 = arith.mulf %240, %242 : vector<8x128xf32>
    %244 = arith.addf %232, %243 : vector<8x128xf32>
    %c4_i32_73 = arith.constant 4 : i32
    %245 = arith.muli %arg1, %c4_i32_73 : i32
    %c0_i32_74 = arith.constant 0 : i32
    %246 = arith.addi %245, %c0_i32_74 : i32
    %c3_i32_75 = arith.constant 3 : i32
    %247 = arith.muli %c3_i32_75, %246 : i32
    %c0_i32_76 = arith.constant 0 : i32
    %248 = arith.addi %247, %c0_i32_76 : i32
    %249 = arith.index_cast %248 : i32 to index
    %250 = memref.load %arg8[%249] : memref<48xf32, #tpu.memory_space<smem>>
    %251 = vector.broadcast %250 : f32 to vector<8x128xf32>
    %252 = arith.mulf %251, %238 : vector<8x128xf32>
    %c1_i32_77 = arith.constant 1 : i32
    %253 = arith.addi %247, %c1_i32_77 : i32
    %254 = arith.index_cast %253 : i32 to index
    %255 = memref.load %arg8[%254] : memref<48xf32, #tpu.memory_space<smem>>
    %256 = vector.broadcast %255 : f32 to vector<8x128xf32>
    %257 = arith.mulf %256, %244 : vector<8x128xf32>
    %258 = arith.addf %252, %257 : vector<8x128xf32>
    %259 = arith.mulf %258, %144 : vector<8x128xf32>
    %c2_i32_78 = arith.constant 2 : i32
    %260 = arith.addi %247, %c2_i32_78 : i32
    %261 = arith.index_cast %260 : i32 to index
    %262 = memref.load %arg8[%261] : memref<48xf32, #tpu.memory_space<smem>>
    %263 = vector.broadcast %262 : f32 to vector<8x128xf32>
    %264 = arith.addf %259, %263 : vector<8x128xf32>
    %c0_79 = arith.constant 0 : index
    %c0_80 = arith.constant 0 : index
    %c0_81 = arith.constant 0 : index
    %265 = vector.load %arg9[%c0_79, %c0_80, %c0_81] : memref<4x8x128xf32, #tpu.memory_space<vmem>>, vector<1x8x128xf32>
    %266 = vector.shape_cast %265 : vector<1x8x128xf32> to vector<8x128xf32>
    %267 = vector.shape_cast %264 : vector<8x128xf32> to vector<1x8x128xf32>
    tpu.vector_store %arg9[%c0_79, %c0_80, %c0_81], %267 {strides = array<i32>} : memref<4x8x128xf32, #tpu.memory_space<vmem>>, vector<1x8x128xf32>,
    %c5_82 = arith.constant 5 : index
    %c0_83 = arith.constant 0 : index
    %c0_84 = arith.constant 0 : index
    %268 = vector.load %arg2[%c5_82, %c0_83, %c0_84] : memref<8x8x128xf32, #tpu.memory_space<vmem>>, vector<1x8x128xf32>
    %269 = vector.shape_cast %268 : vector<1x8x128xf32> to vector<8x128xf32>
    %cst_85 = arith.constant 0.000000e+00 : f32
    %270 = vector.broadcast %cst_85 : f32 to vector<8x128xf32>
    %cst_86 = arith.constant 0.000000e+00 : f32
    %271 = vector.broadcast %cst_86 : f32 to vector<8x128xf32>
    %272 = vector.extract_strided_slice %142 {offsets = [0, 0, 0], sizes = [1, 8, 128], strides = [1, 1, 1]} : vector<8x8x128xf32> to vector<1x8x128xf32>
    %273 = vector.shape_cast %272 : vector<1x8x128xf32> to vector<8x128xf32>
    %274 = vector.extract_strided_slice %269 {offsets = [0, 0], sizes = [1, 128], strides = [1, 1]} : vector<8x128xf32> to vector<1x128xf32>
    %275 = vector.broadcast %274 : vector<1x128xf32> to vector<8x128xf32>
    %276 = arith.mulf %273, %275 : vector<8x128xf32>
    %277 = arith.addf %270, %276 : vector<8x128xf32>
    %278 = vector.extract_strided_slice %142 {offsets = [0, 0, 0], sizes = [1, 8, 128], strides = [1, 1, 1]} : vector<8x8x128xf32> to vector<1x8x128xf32>
    %279 = vector.shape_cast %278 : vector<1x8x128xf32> to vector<8x128xf32>
    %c1_87 = arith.constant 1 : index
    %c0_88 = arith.constant 0 : index
    %c0_89 = arith.constant 0 : index
    %c0_90 = arith.constant 0 : index
    %280 = vector.load %arg6[%c1_87, %c0_88, %c0_89, %c0_90] : memref<4x8x8x128xf32, #tpu.memory_space<vmem>>, vector<1x1x8x128xf32>
    %281 = vector.shape_cast %280 : vector<1x1x8x128xf32> to vector<8x128xf32>
    %282 = arith.mulf %279, %281 : vector<8x128xf32>
    %283 = arith.addf %271, %282 : vector<8x128xf32>
    %284 = vector.extract_strided_slice %142 {offsets = [1, 0, 0], sizes = [1, 8, 128], strides = [1, 1, 1]} : vector<8x8x128xf32> to vector<1x8x128xf32>
    %285 = vector.shape_cast %284 : vector<1x8x128xf32> to vector<8x128xf32>
    %286 = vector.extract_strided_slice %269 {offsets = [1, 0], sizes = [1, 128], strides = [1, 1]} : vector<8x128xf32> to vector<1x128xf32>
    %287 = vector.broadcast %286 : vector<1x128xf32> to vector<8x128xf32>
    %288 = arith.mulf %285, %287 : vector<8x128xf32>
    %289 = arith.addf %277, %288 : vector<8x128xf32>
    %290 = vector.extract_strided_slice %142 {offsets = [1, 0, 0], sizes = [1, 8, 128], strides = [1, 1, 1]} : vector<8x8x128xf32> to vector<1x8x128xf32>
    %291 = vector.shape_cast %290 : vector<1x8x128xf32> to vector<8x128xf32>
    %c1_91 = arith.constant 1 : index
    %c1_92 = arith.constant 1 : index
    %c0_93 = arith.constant 0 : index
    %c0_94 = arith.constant 0 : index
    %292 = vector.load %arg6[%c1_91, %c1_92, %c0_93, %c0_94] : memref<4x8x8x128xf32, #tpu.memory_space<vmem>>, vector<1x1x8x128xf32>
    %293 = vector.shape_cast %292 : vector<1x1x8x128xf32> to vector<8x128xf32>
    %294 = arith.mulf %291, %293 : vector<8x128xf32>
    %295 = arith.addf %283, %294 : vector<8x128xf32>
    %296 = vector.extract_strided_slice %142 {offsets = [2, 0, 0], sizes = [1, 8, 128], strides = [1, 1, 1]} : vector<8x8x128xf32> to vector<1x8x128xf32>
    %297 = vector.shape_cast %296 : vector<1x8x128xf32> to vector<8x128xf32>
    %298 = vector.extract_strided_slice %269 {offsets = [2, 0], sizes = [1, 128], strides = [1, 1]} : vector<8x128xf32> to vector<1x128xf32>
    %299 = vector.broadcast %298 : vector<1x128xf32> to vector<8x128xf32>
    %300 = arith.mulf %297, %299 : vector<8x128xf32>
    %301 = arith.addf %289, %300 : vector<8x128xf32>
    %302 = vector.extract_strided_slice %142 {offsets = [2, 0, 0], sizes = [1, 8, 128], strides = [1, 1, 1]} : vector<8x8x128xf32> to vector<1x8x128xf32>
    %303 = vector.shape_cast %302 : vector<1x8x128xf32> to vector<8x128xf32>
    %c1_95 = arith.constant 1 : index
    %c2_96 = arith.constant 2 : index
    %c0_97 = arith.constant 0 : index
    %c0_98 = arith.constant 0 : index
    %304 = vector.load %arg6[%c1_95, %c2_96, %c0_97, %c0_98] : memref<4x8x8x128xf32, #tpu.memory_space<vmem>>, vector<1x1x8x128xf32>
    %305 = vector.shape_cast %304 : vector<1x1x8x128xf32> to vector<8x128xf32>
    %306 = arith.mulf %303, %305 : vector<8x128xf32>
    %307 = arith.addf %295, %306 : vector<8x128xf32>
    %308 = vector.extract_strided_slice %142 {offsets = [3, 0, 0], sizes = [1, 8, 128], strides = [1, 1, 1]} : vector<8x8x128xf32> to vector<1x8x128xf32>
    %309 = vector.shape_cast %308 : vector<1x8x128xf32> to vector<8x128xf32>
    %310 = vector.extract_strided_slice %269 {offsets = [3, 0], sizes = [1, 128], strides = [1, 1]} : vector<8x128xf32> to vector<1x128xf32>
    %311 = vector.broadcast %310 : vector<1x128xf32> to vector<8x128xf32>
    %312 = arith.mulf %309, %311 : vector<8x128xf32>
    %313 = arith.addf %301, %312 : vector<8x128xf32>
    %314 = vector.extract_strided_slice %142 {offsets = [3, 0, 0], sizes = [1, 8, 128], strides = [1, 1, 1]} : vector<8x8x128xf32> to vector<1x8x128xf32>
    %315 = vector.shape_cast %314 : vector<1x8x128xf32> to vector<8x128xf32>
    %c1_99 = arith.constant 1 : index
    %c3_100 = arith.constant 3 : index
    %c0_101 = arith.constant 0 : index
    %c0_102 = arith.constant 0 : index
    %316 = vector.load %arg6[%c1_99, %c3_100, %c0_101, %c0_102] : memref<4x8x8x128xf32, #tpu.memory_space<vmem>>, vector<1x1x8x128xf32>
    %317 = vector.shape_cast %316 : vector<1x1x8x128xf32> to vector<8x128xf32>
    %318 = arith.mulf %315, %317 : vector<8x128xf32>
    %319 = arith.addf %307, %318 : vector<8x128xf32>
    %320 = vector.extract_strided_slice %142 {offsets = [4, 0, 0], sizes = [1, 8, 128], strides = [1, 1, 1]} : vector<8x8x128xf32> to vector<1x8x128xf32>
    %321 = vector.shape_cast %320 : vector<1x8x128xf32> to vector<8x128xf32>
    %322 = vector.extract_strided_slice %269 {offsets = [4, 0], sizes = [1, 128], strides = [1, 1]} : vector<8x128xf32> to vector<1x128xf32>
    %323 = vector.broadcast %322 : vector<1x128xf32> to vector<8x128xf32>
    %324 = arith.mulf %321, %323 : vector<8x128xf32>
    %325 = arith.addf %313, %324 : vector<8x128xf32>
    %326 = vector.extract_strided_slice %142 {offsets = [4, 0, 0], sizes = [1, 8, 128], strides = [1, 1, 1]} : vector<8x8x128xf32> to vector<1x8x128xf32>
    %327 = vector.shape_cast %326 : vector<1x8x128xf32> to vector<8x128xf32>
    %c1_103 = arith.constant 1 : index
    %c4_104 = arith.constant 4 : index
    %c0_105 = arith.constant 0 : index
    %c0_106 = arith.constant 0 : index
    %328 = vector.load %arg6[%c1_103, %c4_104, %c0_105, %c0_106] : memref<4x8x8x128xf32, #tpu.memory_space<vmem>>, vector<1x1x8x128xf32>
    %329 = vector.shape_cast %328 : vector<1x1x8x128xf32> to vector<8x128xf32>
    %330 = arith.mulf %327, %329 : vector<8x128xf32>
    %331 = arith.addf %319, %330 : vector<8x128xf32>
    %332 = vector.extract_strided_slice %142 {offsets = [5, 0, 0], sizes = [1, 8, 128], strides = [1, 1, 1]} : vector<8x8x128xf32> to vector<1x8x128xf32>
    %333 = vector.shape_cast %332 : vector<1x8x128xf32> to vector<8x128xf32>
    %334 = vector.extract_strided_slice %269 {offsets = [5, 0], sizes = [1, 128], strides = [1, 1]} : vector<8x128xf32> to vector<1x128xf32>
    %335 = vector.broadcast %334 : vector<1x128xf32> to vector<8x128xf32>
    %336 = arith.mulf %333, %335 : vector<8x128xf32>
    %337 = arith.addf %325, %336 : vector<8x128xf32>
    %338 = vector.extract_strided_slice %142 {offsets = [5, 0, 0], sizes = [1, 8, 128], strides = [1, 1, 1]} : vector<8x8x128xf32> to vector<1x8x128xf32>
    %339 = vector.shape_cast %338 : vector<1x8x128xf32> to vector<8x128xf32>
    %c1_107 = arith.constant 1 : index
    %c5_108 = arith.constant 5 : index
    %c0_109 = arith.constant 0 : index
    %c0_110 = arith.constant 0 : index
    %340 = vector.load %arg6[%c1_107, %c5_108, %c0_109, %c0_110] : memref<4x8x8x128xf32, #tpu.memory_space<vmem>>, vector<1x1x8x128xf32>
    %341 = vector.shape_cast %340 : vector<1x1x8x128xf32> to vector<8x128xf32>
    %342 = arith.mulf %339, %341 : vector<8x128xf32>
    %343 = arith.addf %331, %342 : vector<8x128xf32>
    %344 = vector.extract_strided_slice %142 {offsets = [6, 0, 0], sizes = [1, 8, 128], strides = [1, 1, 1]} : vector<8x8x128xf32> to vector<1x8x128xf32>
    %345 = vector.shape_cast %344 : vector<1x8x128xf32> to vector<8x128xf32>
    %346 = vector.extract_strided_slice %269 {offsets = [6, 0], sizes = [1, 128], strides = [1, 1]} : vector<8x128xf32> to vector<1x128xf32>
    %347 = vector.broadcast %346 : vector<1x128xf32> to vector<8x128xf32>
    %348 = arith.mulf %345, %347 : vector<8x128xf32>
    %349 = arith.addf %337, %348 : vector<8x128xf32>
    %350 = vector.extract_strided_slice %142 {offsets = [6, 0, 0], sizes = [1, 8, 128], strides = [1, 1, 1]} : vector<8x8x128xf32> to vector<1x8x128xf32>
    %351 = vector.shape_cast %350 : vector<1x8x128xf32> to vector<8x128xf32>
    %c1_111 = arith.constant 1 : index
    %c6_112 = arith.constant 6 : index
    %c0_113 = arith.constant 0 : index
    %c0_114 = arith.constant 0 : index
    %352 = vector.load %arg6[%c1_111, %c6_112, %c0_113, %c0_114] : memref<4x8x8x128xf32, #tpu.memory_space<vmem>>, vector<1x1x8x128xf32>
    %353 = vector.shape_cast %352 : vector<1x1x8x128xf32> to vector<8x128xf32>
    %354 = arith.mulf %351, %353 : vector<8x128xf32>
    %355 = arith.addf %343, %354 : vector<8x128xf32>
    %356 = vector.extract_strided_slice %142 {offsets = [7, 0, 0], sizes = [1, 8, 128], strides = [1, 1, 1]} : vector<8x8x128xf32> to vector<1x8x128xf32>
    %357 = vector.shape_cast %356 : vector<1x8x128xf32> to vector<8x128xf32>
    %358 = vector.extract_strided_slice %269 {offsets = [7, 0], sizes = [1, 128], strides = [1, 1]} : vector<8x128xf32> to vector<1x128xf32>
    %359 = vector.broadcast %358 : vector<1x128xf32> to vector<8x128xf32>
    %360 = arith.mulf %357, %359 : vector<8x128xf32>
    %361 = arith.addf %349, %360 : vector<8x128xf32>
    %362 = vector.extract_strided_slice %142 {offsets = [7, 0, 0], sizes = [1, 8, 128], strides = [1, 1, 1]} : vector<8x8x128xf32> to vector<1x8x128xf32>
    %363 = vector.shape_cast %362 : vector<1x8x128xf32> to vector<8x128xf32>
    %c1_115 = arith.constant 1 : index
    %c7_116 = arith.constant 7 : index
    %c0_117 = arith.constant 0 : index
    %c0_118 = arith.constant 0 : index
    %364 = vector.load %arg6[%c1_115, %c7_116, %c0_117, %c0_118] : memref<4x8x8x128xf32, #tpu.memory_space<vmem>>, vector<1x1x8x128xf32>
    %365 = vector.shape_cast %364 : vector<1x1x8x128xf32> to vector<8x128xf32>
    %366 = arith.mulf %363, %365 : vector<8x128xf32>
    %367 = arith.addf %355, %366 : vector<8x128xf32>
    %c4_i32_119 = arith.constant 4 : i32
    %368 = arith.muli %arg1, %c4_i32_119 : i32
    %c1_i32_120 = arith.constant 1 : i32
    %369 = arith.addi %368, %c1_i32_120 : i32
    %c3_i32_121 = arith.constant 3 : i32
    %370 = arith.muli %c3_i32_121, %369 : i32
    %c0_i32_122 = arith.constant 0 : i32
    %371 = arith.addi %370, %c0_i32_122 : i32
    %372 = arith.index_cast %371 : i32 to index
    %373 = memref.load %arg8[%372] : memref<48xf32, #tpu.memory_space<smem>>
    %374 = vector.broadcast %373 : f32 to vector<8x128xf32>
    %375 = arith.mulf %374, %361 : vector<8x128xf32>
    %c1_i32_123 = arith.constant 1 : i32
    %376 = arith.addi %370, %c1_i32_123 : i32
    %377 = arith.index_cast %376 : i32 to index
    %378 = memref.load %arg8[%377] : memref<48xf32, #tpu.memory_space<smem>>
    %379 = vector.broadcast %378 : f32 to vector<8x128xf32>
    %380 = arith.mulf %379, %367 : vector<8x128xf32>
    %381 = arith.addf %375, %380 : vector<8x128xf32>
    %382 = arith.mulf %381, %144 : vector<8x128xf32>
    %c2_i32_124 = arith.constant 2 : i32
    %383 = arith.addi %370, %c2_i32_124 : i32
    %384 = arith.index_cast %383 : i32 to index
    %385 = memref.load %arg8[%384] : memref<48xf32, #tpu.memory_space<smem>>
    %386 = vector.broadcast %385 : f32 to vector<8x128xf32>
    %387 = arith.addf %382, %386 : vector<8x128xf32>
    %c1_125 = arith.constant 1 : index
    %c0_126 = arith.constant 0 : index
    %c0_127 = arith.constant 0 : index
    %388 = vector.load %arg9[%c1_125, %c0_126, %c0_127] : memref<4x8x128xf32, #tpu.memory_space<vmem>>, vector<1x8x128xf32>
    %389 = vector.shape_cast %388 : vector<1x8x128xf32> to vector<8x128xf32>
    %390 = vector.shape_cast %387 : vector<8x128xf32> to vector<1x8x128xf32>
    tpu.vector_store %arg9[%c1_125, %c0_126, %c0_127], %390 {strides = array<i32>} : memref<4x8x128xf32, #tpu.memory_space<vmem>>, vector<1x8x128xf32>,
    %c6_128 = arith.constant 6 : index
    %c0_129 = arith.constant 0 : index
    %c0_130 = arith.constant 0 : index
    %391 = vector.load %arg2[%c6_128, %c0_129, %c0_130] : memref<8x8x128xf32, #tpu.memory_space<vmem>>, vector<1x8x128xf32>
    %392 = vector.shape_cast %391 : vector<1x8x128xf32> to vector<8x128xf32>
    %cst_131 = arith.constant 0.000000e+00 : f32
    %393 = vector.broadcast %cst_131 : f32 to vector<8x128xf32>
    %cst_132 = arith.constant 0.000000e+00 : f32
    %394 = vector.broadcast %cst_132 : f32 to vector<8x128xf32>
    %395 = vector.extract_strided_slice %142 {offsets = [0, 0, 0], sizes = [1, 8, 128], strides = [1, 1, 1]} : vector<8x8x128xf32> to vector<1x8x128xf32>
    %396 = vector.shape_cast %395 : vector<1x8x128xf32> to vector<8x128xf32>
    %397 = vector.extract_strided_slice %392 {offsets = [0, 0], sizes = [1, 128], strides = [1, 1]} : vector<8x128xf32> to vector<1x128xf32>
    %398 = vector.broadcast %397 : vector<1x128xf32> to vector<8x128xf32>
    %399 = arith.mulf %396, %398 : vector<8x128xf32>
    %400 = arith.addf %393, %399 : vector<8x128xf32>
    %401 = vector.extract_strided_slice %142 {offsets = [0, 0, 0], sizes = [1, 8, 128], strides = [1, 1, 1]} : vector<8x8x128xf32> to vector<1x8x128xf32>
    %402 = vector.shape_cast %401 : vector<1x8x128xf32> to vector<8x128xf32>
    %c2_133 = arith.constant 2 : index
    %c0_134 = arith.constant 0 : index
    %c0_135 = arith.constant 0 : index
    %c0_136 = arith.constant 0 : index
    %403 = vector.load %arg6[%c2_133, %c0_134, %c0_135, %c0_136] : memref<4x8x8x128xf32, #tpu.memory_space<vmem>>, vector<1x1x8x128xf32>
    %404 = vector.shape_cast %403 : vector<1x1x8x128xf32> to vector<8x128xf32>
    %405 = arith.mulf %402, %404 : vector<8x128xf32>
    %406 = arith.addf %394, %405 : vector<8x128xf32>
    %407 = vector.extract_strided_slice %142 {offsets = [1, 0, 0], sizes = [1, 8, 128], strides = [1, 1, 1]} : vector<8x8x128xf32> to vector<1x8x128xf32>
    %408 = vector.shape_cast %407 : vector<1x8x128xf32> to vector<8x128xf32>
    %409 = vector.extract_strided_slice %392 {offsets = [1, 0], sizes = [1, 128], strides = [1, 1]} : vector<8x128xf32> to vector<1x128xf32>
    %410 = vector.broadcast %409 : vector<1x128xf32> to vector<8x128xf32>
    %411 = arith.mulf %408, %410 : vector<8x128xf32>
    %412 = arith.addf %400, %411 : vector<8x128xf32>
    %413 = vector.extract_strided_slice %142 {offsets = [1, 0, 0], sizes = [1, 8, 128], strides = [1, 1, 1]} : vector<8x8x128xf32> to vector<1x8x128xf32>
    %414 = vector.shape_cast %413 : vector<1x8x128xf32> to vector<8x128xf32>
    %c2_137 = arith.constant 2 : index
    %c1_138 = arith.constant 1 : index
    %c0_139 = arith.constant 0 : index
    %c0_140 = arith.constant 0 : index
    %415 = vector.load %arg6[%c2_137, %c1_138, %c0_139, %c0_140] : memref<4x8x8x128xf32, #tpu.memory_space<vmem>>, vector<1x1x8x128xf32>
    %416 = vector.shape_cast %415 : vector<1x1x8x128xf32> to vector<8x128xf32>
    %417 = arith.mulf %414, %416 : vector<8x128xf32>
    %418 = arith.addf %406, %417 : vector<8x128xf32>
    %419 = vector.extract_strided_slice %142 {offsets = [2, 0, 0], sizes = [1, 8, 128], strides = [1, 1, 1]} : vector<8x8x128xf32> to vector<1x8x128xf32>
    %420 = vector.shape_cast %419 : vector<1x8x128xf32> to vector<8x128xf32>
    %421 = vector.extract_strided_slice %392 {offsets = [2, 0], sizes = [1, 128], strides = [1, 1]} : vector<8x128xf32> to vector<1x128xf32>
    %422 = vector.broadcast %421 : vector<1x128xf32> to vector<8x128xf32>
    %423 = arith.mulf %420, %422 : vector<8x128xf32>
    %424 = arith.addf %412, %423 : vector<8x128xf32>
    %425 = vector.extract_strided_slice %142 {offsets = [2, 0, 0], sizes = [1, 8, 128], strides = [1, 1, 1]} : vector<8x8x128xf32> to vector<1x8x128xf32>
    %426 = vector.shape_cast %425 : vector<1x8x128xf32> to vector<8x128xf32>
    %c2_141 = arith.constant 2 : index
    %c2_142 = arith.constant 2 : index
    %c0_143 = arith.constant 0 : index
    %c0_144 = arith.constant 0 : index
    %427 = vector.load %arg6[%c2_141, %c2_142, %c0_143, %c0_144] : memref<4x8x8x128xf32, #tpu.memory_space<vmem>>, vector<1x1x8x128xf32>
    %428 = vector.shape_cast %427 : vector<1x1x8x128xf32> to vector<8x128xf32>
    %429 = arith.mulf %426, %428 : vector<8x128xf32>
    %430 = arith.addf %418, %429 : vector<8x128xf32>
    %431 = vector.extract_strided_slice %142 {offsets = [3, 0, 0], sizes = [1, 8, 128], strides = [1, 1, 1]} : vector<8x8x128xf32> to vector<1x8x128xf32>
    %432 = vector.shape_cast %431 : vector<1x8x128xf32> to vector<8x128xf32>
    %433 = vector.extract_strided_slice %392 {offsets = [3, 0], sizes = [1, 128], strides = [1, 1]} : vector<8x128xf32> to vector<1x128xf32>
    %434 = vector.broadcast %433 : vector<1x128xf32> to vector<8x128xf32>
    %435 = arith.mulf %432, %434 : vector<8x128xf32>
    %436 = arith.addf %424, %435 : vector<8x128xf32>
    %437 = vector.extract_strided_slice %142 {offsets = [3, 0, 0], sizes = [1, 8, 128], strides = [1, 1, 1]} : vector<8x8x128xf32> to vector<1x8x128xf32>
    %438 = vector.shape_cast %437 : vector<1x8x128xf32> to vector<8x128xf32>
    %c2_145 = arith.constant 2 : index
    %c3_146 = arith.constant 3 : index
    %c0_147 = arith.constant 0 : index
    %c0_148 = arith.constant 0 : index
    %439 = vector.load %arg6[%c2_145, %c3_146, %c0_147, %c0_148] : memref<4x8x8x128xf32, #tpu.memory_space<vmem>>, vector<1x1x8x128xf32>
    %440 = vector.shape_cast %439 : vector<1x1x8x128xf32> to vector<8x128xf32>
    %441 = arith.mulf %438, %440 : vector<8x128xf32>
    %442 = arith.addf %430, %441 : vector<8x128xf32>
    %443 = vector.extract_strided_slice %142 {offsets = [4, 0, 0], sizes = [1, 8, 128], strides = [1, 1, 1]} : vector<8x8x128xf32> to vector<1x8x128xf32>
    %444 = vector.shape_cast %443 : vector<1x8x128xf32> to vector<8x128xf32>
    %445 = vector.extract_strided_slice %392 {offsets = [4, 0], sizes = [1, 128], strides = [1, 1]} : vector<8x128xf32> to vector<1x128xf32>
    %446 = vector.broadcast %445 : vector<1x128xf32> to vector<8x128xf32>
    %447 = arith.mulf %444, %446 : vector<8x128xf32>
    %448 = arith.addf %436, %447 : vector<8x128xf32>
    %449 = vector.extract_strided_slice %142 {offsets = [4, 0, 0], sizes = [1, 8, 128], strides = [1, 1, 1]} : vector<8x8x128xf32> to vector<1x8x128xf32>
    %450 = vector.shape_cast %449 : vector<1x8x128xf32> to vector<8x128xf32>
    %c2_149 = arith.constant 2 : index
    %c4_150 = arith.constant 4 : index
    %c0_151 = arith.constant 0 : index
    %c0_152 = arith.constant 0 : index
    %451 = vector.load %arg6[%c2_149, %c4_150, %c0_151, %c0_152] : memref<4x8x8x128xf32, #tpu.memory_space<vmem>>, vector<1x1x8x128xf32>
    %452 = vector.shape_cast %451 : vector<1x1x8x128xf32> to vector<8x128xf32>
    %453 = arith.mulf %450, %452 : vector<8x128xf32>
    %454 = arith.addf %442, %453 : vector<8x128xf32>
    %455 = vector.extract_strided_slice %142 {offsets = [5, 0, 0], sizes = [1, 8, 128], strides = [1, 1, 1]} : vector<8x8x128xf32> to vector<1x8x128xf32>
    %456 = vector.shape_cast %455 : vector<1x8x128xf32> to vector<8x128xf32>
    %457 = vector.extract_strided_slice %392 {offsets = [5, 0], sizes = [1, 128], strides = [1, 1]} : vector<8x128xf32> to vector<1x128xf32>
    %458 = vector.broadcast %457 : vector<1x128xf32> to vector<8x128xf32>
    %459 = arith.mulf %456, %458 : vector<8x128xf32>
    %460 = arith.addf %448, %459 : vector<8x128xf32>
    %461 = vector.extract_strided_slice %142 {offsets = [5, 0, 0], sizes = [1, 8, 128], strides = [1, 1, 1]} : vector<8x8x128xf32> to vector<1x8x128xf32>
    %462 = vector.shape_cast %461 : vector<1x8x128xf32> to vector<8x128xf32>
    %c2_153 = arith.constant 2 : index
    %c5_154 = arith.constant 5 : index
    %c0_155 = arith.constant 0 : index
    %c0_156 = arith.constant 0 : index
    %463 = vector.load %arg6[%c2_153, %c5_154, %c0_155, %c0_156] : memref<4x8x8x128xf32, #tpu.memory_space<vmem>>, vector<1x1x8x128xf32>
    %464 = vector.shape_cast %463 : vector<1x1x8x128xf32> to vector<8x128xf32>
    %465 = arith.mulf %462, %464 : vector<8x128xf32>
    %466 = arith.addf %454, %465 : vector<8x128xf32>
    %467 = vector.extract_strided_slice %142 {offsets = [6, 0, 0], sizes = [1, 8, 128], strides = [1, 1, 1]} : vector<8x8x128xf32> to vector<1x8x128xf32>
    %468 = vector.shape_cast %467 : vector<1x8x128xf32> to vector<8x128xf32>
    %469 = vector.extract_strided_slice %392 {offsets = [6, 0], sizes = [1, 128], strides = [1, 1]} : vector<8x128xf32> to vector<1x128xf32>
    %470 = vector.broadcast %469 : vector<1x128xf32> to vector<8x128xf32>
    %471 = arith.mulf %468, %470 : vector<8x128xf32>
    %472 = arith.addf %460, %471 : vector<8x128xf32>
    %473 = vector.extract_strided_slice %142 {offsets = [6, 0, 0], sizes = [1, 8, 128], strides = [1, 1, 1]} : vector<8x8x128xf32> to vector<1x8x128xf32>
    %474 = vector.shape_cast %473 : vector<1x8x128xf32> to vector<8x128xf32>
    %c2_157 = arith.constant 2 : index
    %c6_158 = arith.constant 6 : index
    %c0_159 = arith.constant 0 : index
    %c0_160 = arith.constant 0 : index
    %475 = vector.load %arg6[%c2_157, %c6_158, %c0_159, %c0_160] : memref<4x8x8x128xf32, #tpu.memory_space<vmem>>, vector<1x1x8x128xf32>
    %476 = vector.shape_cast %475 : vector<1x1x8x128xf32> to vector<8x128xf32>
    %477 = arith.mulf %474, %476 : vector<8x128xf32>
    %478 = arith.addf %466, %477 : vector<8x128xf32>
    %479 = vector.extract_strided_slice %142 {offsets = [7, 0, 0], sizes = [1, 8, 128], strides = [1, 1, 1]} : vector<8x8x128xf32> to vector<1x8x128xf32>
    %480 = vector.shape_cast %479 : vector<1x8x128xf32> to vector<8x128xf32>
    %481 = vector.extract_strided_slice %392 {offsets = [7, 0], sizes = [1, 128], strides = [1, 1]} : vector<8x128xf32> to vector<1x128xf32>
    %482 = vector.broadcast %481 : vector<1x128xf32> to vector<8x128xf32>
    %483 = arith.mulf %480, %482 : vector<8x128xf32>
    %484 = arith.addf %472, %483 : vector<8x128xf32>
    %485 = vector.extract_strided_slice %142 {offsets = [7, 0, 0], sizes = [1, 8, 128], strides = [1, 1, 1]} : vector<8x8x128xf32> to vector<1x8x128xf32>
    %486 = vector.shape_cast %485 : vector<1x8x128xf32> to vector<8x128xf32>
    %c2_161 = arith.constant 2 : index
    %c7_162 = arith.constant 7 : index
    %c0_163 = arith.constant 0 : index
    %c0_164 = arith.constant 0 : index
    %487 = vector.load %arg6[%c2_161, %c7_162, %c0_163, %c0_164] : memref<4x8x8x128xf32, #tpu.memory_space<vmem>>, vector<1x1x8x128xf32>
    %488 = vector.shape_cast %487 : vector<1x1x8x128xf32> to vector<8x128xf32>
    %489 = arith.mulf %486, %488 : vector<8x128xf32>
    %490 = arith.addf %478, %489 : vector<8x128xf32>
    %c4_i32_165 = arith.constant 4 : i32
    %491 = arith.muli %arg1, %c4_i32_165 : i32
    %c2_i32_166 = arith.constant 2 : i32
    %492 = arith.addi %491, %c2_i32_166 : i32
    %c3_i32_167 = arith.constant 3 : i32
    %493 = arith.muli %c3_i32_167, %492 : i32
    %c0_i32_168 = arith.constant 0 : i32
    %494 = arith.addi %493, %c0_i32_168 : i32
    %495 = arith.index_cast %494 : i32 to index
    %496 = memref.load %arg8[%495] : memref<48xf32, #tpu.memory_space<smem>>
    %497 = vector.broadcast %496 : f32 to vector<8x128xf32>
    %498 = arith.mulf %497, %484 : vector<8x128xf32>
    %c1_i32_169 = arith.constant 1 : i32
    %499 = arith.addi %493, %c1_i32_169 : i32
    %500 = arith.index_cast %499 : i32 to index
    %501 = memref.load %arg8[%500] : memref<48xf32, #tpu.memory_space<smem>>
    %502 = vector.broadcast %501 : f32 to vector<8x128xf32>
    %503 = arith.mulf %502, %490 : vector<8x128xf32>
    %504 = arith.addf %498, %503 : vector<8x128xf32>
    %505 = arith.mulf %504, %144 : vector<8x128xf32>
    %c2_i32_170 = arith.constant 2 : i32
    %506 = arith.addi %493, %c2_i32_170 : i32
    %507 = arith.index_cast %506 : i32 to index
    %508 = memref.load %arg8[%507] : memref<48xf32, #tpu.memory_space<smem>>
    %509 = vector.broadcast %508 : f32 to vector<8x128xf32>
    %510 = arith.addf %505, %509 : vector<8x128xf32>
    %c2_171 = arith.constant 2 : index
    %c0_172 = arith.constant 0 : index
    %c0_173 = arith.constant 0 : index
    %511 = vector.load %arg9[%c2_171, %c0_172, %c0_173] : memref<4x8x128xf32, #tpu.memory_space<vmem>>, vector<1x8x128xf32>
    %512 = vector.shape_cast %511 : vector<1x8x128xf32> to vector<8x128xf32>
    %513 = vector.shape_cast %510 : vector<8x128xf32> to vector<1x8x128xf32>
    tpu.vector_store %arg9[%c2_171, %c0_172, %c0_173], %513 {strides = array<i32>} : memref<4x8x128xf32, #tpu.memory_space<vmem>>, vector<1x8x128xf32>,
    %c7_174 = arith.constant 7 : index
    %c0_175 = arith.constant 0 : index
    %c0_176 = arith.constant 0 : index
    %514 = vector.load %arg2[%c7_174, %c0_175, %c0_176] : memref<8x8x128xf32, #tpu.memory_space<vmem>>, vector<1x8x128xf32>
    %515 = vector.shape_cast %514 : vector<1x8x128xf32> to vector<8x128xf32>
    %cst_177 = arith.constant 0.000000e+00 : f32
    %516 = vector.broadcast %cst_177 : f32 to vector<8x128xf32>
    %cst_178 = arith.constant 0.000000e+00 : f32
    %517 = vector.broadcast %cst_178 : f32 to vector<8x128xf32>
    %518 = vector.extract_strided_slice %142 {offsets = [0, 0, 0], sizes = [1, 8, 128], strides = [1, 1, 1]} : vector<8x8x128xf32> to vector<1x8x128xf32>
    %519 = vector.shape_cast %518 : vector<1x8x128xf32> to vector<8x128xf32>
    %520 = vector.extract_strided_slice %515 {offsets = [0, 0], sizes = [1, 128], strides = [1, 1]} : vector<8x128xf32> to vector<1x128xf32>
    %521 = vector.broadcast %520 : vector<1x128xf32> to vector<8x128xf32>
    %522 = arith.mulf %519, %521 : vector<8x128xf32>
    %523 = arith.addf %516, %522 : vector<8x128xf32>
    %524 = vector.extract_strided_slice %142 {offsets = [0, 0, 0], sizes = [1, 8, 128], strides = [1, 1, 1]} : vector<8x8x128xf32> to vector<1x8x128xf32>
    %525 = vector.shape_cast %524 : vector<1x8x128xf32> to vector<8x128xf32>
    %c3_179 = arith.constant 3 : index
    %c0_180 = arith.constant 0 : index
    %c0_181 = arith.constant 0 : index
    %c0_182 = arith.constant 0 : index
    %526 = vector.load %arg6[%c3_179, %c0_180, %c0_181, %c0_182] : memref<4x8x8x128xf32, #tpu.memory_space<vmem>>, vector<1x1x8x128xf32>
    %527 = vector.shape_cast %526 : vector<1x1x8x128xf32> to vector<8x128xf32>
    %528 = arith.mulf %525, %527 : vector<8x128xf32>
    %529 = arith.addf %517, %528 : vector<8x128xf32>
    %530 = vector.extract_strided_slice %142 {offsets = [1, 0, 0], sizes = [1, 8, 128], strides = [1, 1, 1]} : vector<8x8x128xf32> to vector<1x8x128xf32>
    %531 = vector.shape_cast %530 : vector<1x8x128xf32> to vector<8x128xf32>
    %532 = vector.extract_strided_slice %515 {offsets = [1, 0], sizes = [1, 128], strides = [1, 1]} : vector<8x128xf32> to vector<1x128xf32>
    %533 = vector.broadcast %532 : vector<1x128xf32> to vector<8x128xf32>
    %534 = arith.mulf %531, %533 : vector<8x128xf32>
    %535 = arith.addf %523, %534 : vector<8x128xf32>
    %536 = vector.extract_strided_slice %142 {offsets = [1, 0, 0], sizes = [1, 8, 128], strides = [1, 1, 1]} : vector<8x8x128xf32> to vector<1x8x128xf32>
    %537 = vector.shape_cast %536 : vector<1x8x128xf32> to vector<8x128xf32>
    %c3_183 = arith.constant 3 : index
    %c1_184 = arith.constant 1 : index
    %c0_185 = arith.constant 0 : index
    %c0_186 = arith.constant 0 : index
    %538 = vector.load %arg6[%c3_183, %c1_184, %c0_185, %c0_186] : memref<4x8x8x128xf32, #tpu.memory_space<vmem>>, vector<1x1x8x128xf32>
    %539 = vector.shape_cast %538 : vector<1x1x8x128xf32> to vector<8x128xf32>
    %540 = arith.mulf %537, %539 : vector<8x128xf32>
    %541 = arith.addf %529, %540 : vector<8x128xf32>
    %542 = vector.extract_strided_slice %142 {offsets = [2, 0, 0], sizes = [1, 8, 128], strides = [1, 1, 1]} : vector<8x8x128xf32> to vector<1x8x128xf32>
    %543 = vector.shape_cast %542 : vector<1x8x128xf32> to vector<8x128xf32>
    %544 = vector.extract_strided_slice %515 {offsets = [2, 0], sizes = [1, 128], strides = [1, 1]} : vector<8x128xf32> to vector<1x128xf32>
    %545 = vector.broadcast %544 : vector<1x128xf32> to vector<8x128xf32>
    %546 = arith.mulf %543, %545 : vector<8x128xf32>
    %547 = arith.addf %535, %546 : vector<8x128xf32>
    %548 = vector.extract_strided_slice %142 {offsets = [2, 0, 0], sizes = [1, 8, 128], strides = [1, 1, 1]} : vector<8x8x128xf32> to vector<1x8x128xf32>
    %549 = vector.shape_cast %548 : vector<1x8x128xf32> to vector<8x128xf32>
    %c3_187 = arith.constant 3 : index
    %c2_188 = arith.constant 2 : index
    %c0_189 = arith.constant 0 : index
    %c0_190 = arith.constant 0 : index
    %550 = vector.load %arg6[%c3_187, %c2_188, %c0_189, %c0_190] : memref<4x8x8x128xf32, #tpu.memory_space<vmem>>, vector<1x1x8x128xf32>
    %551 = vector.shape_cast %550 : vector<1x1x8x128xf32> to vector<8x128xf32>
    %552 = arith.mulf %549, %551 : vector<8x128xf32>
    %553 = arith.addf %541, %552 : vector<8x128xf32>
    %554 = vector.extract_strided_slice %142 {offsets = [3, 0, 0], sizes = [1, 8, 128], strides = [1, 1, 1]} : vector<8x8x128xf32> to vector<1x8x128xf32>
    %555 = vector.shape_cast %554 : vector<1x8x128xf32> to vector<8x128xf32>
    %556 = vector.extract_strided_slice %515 {offsets = [3, 0], sizes = [1, 128], strides = [1, 1]} : vector<8x128xf32> to vector<1x128xf32>
    %557 = vector.broadcast %556 : vector<1x128xf32> to vector<8x128xf32>
    %558 = arith.mulf %555, %557 : vector<8x128xf32>
    %559 = arith.addf %547, %558 : vector<8x128xf32>
    %560 = vector.extract_strided_slice %142 {offsets = [3, 0, 0], sizes = [1, 8, 128], strides = [1, 1, 1]} : vector<8x8x128xf32> to vector<1x8x128xf32>
    %561 = vector.shape_cast %560 : vector<1x8x128xf32> to vector<8x128xf32>
    %c3_191 = arith.constant 3 : index
    %c3_192 = arith.constant 3 : index
    %c0_193 = arith.constant 0 : index
    %c0_194 = arith.constant 0 : index
    %562 = vector.load %arg6[%c3_191, %c3_192, %c0_193, %c0_194] : memref<4x8x8x128xf32, #tpu.memory_space<vmem>>, vector<1x1x8x128xf32>
    %563 = vector.shape_cast %562 : vector<1x1x8x128xf32> to vector<8x128xf32>
    %564 = arith.mulf %561, %563 : vector<8x128xf32>
    %565 = arith.addf %553, %564 : vector<8x128xf32>
    %566 = vector.extract_strided_slice %142 {offsets = [4, 0, 0], sizes = [1, 8, 128], strides = [1, 1, 1]} : vector<8x8x128xf32> to vector<1x8x128xf32>
    %567 = vector.shape_cast %566 : vector<1x8x128xf32> to vector<8x128xf32>
    %568 = vector.extract_strided_slice %515 {offsets = [4, 0], sizes = [1, 128], strides = [1, 1]} : vector<8x128xf32> to vector<1x128xf32>
    %569 = vector.broadcast %568 : vector<1x128xf32> to vector<8x128xf32>
    %570 = arith.mulf %567, %569 : vector<8x128xf32>
    %571 = arith.addf %559, %570 : vector<8x128xf32>
    %572 = vector.extract_strided_slice %142 {offsets = [4, 0, 0], sizes = [1, 8, 128], strides = [1, 1, 1]} : vector<8x8x128xf32> to vector<1x8x128xf32>
    %573 = vector.shape_cast %572 : vector<1x8x128xf32> to vector<8x128xf32>
    %c3_195 = arith.constant 3 : index
    %c4_196 = arith.constant 4 : index
    %c0_197 = arith.constant 0 : index
    %c0_198 = arith.constant 0 : index
    %574 = vector.load %arg6[%c3_195, %c4_196, %c0_197, %c0_198] : memref<4x8x8x128xf32, #tpu.memory_space<vmem>>, vector<1x1x8x128xf32>
    %575 = vector.shape_cast %574 : vector<1x1x8x128xf32> to vector<8x128xf32>
    %576 = arith.mulf %573, %575 : vector<8x128xf32>
    %577 = arith.addf %565, %576 : vector<8x128xf32>
    %578 = vector.extract_strided_slice %142 {offsets = [5, 0, 0], sizes = [1, 8, 128], strides = [1, 1, 1]} : vector<8x8x128xf32> to vector<1x8x128xf32>
    %579 = vector.shape_cast %578 : vector<1x8x128xf32> to vector<8x128xf32>
    %580 = vector.extract_strided_slice %515 {offsets = [5, 0], sizes = [1, 128], strides = [1, 1]} : vector<8x128xf32> to vector<1x128xf32>
    %581 = vector.broadcast %580 : vector<1x128xf32> to vector<8x128xf32>
    %582 = arith.mulf %579, %581 : vector<8x128xf32>
    %583 = arith.addf %571, %582 : vector<8x128xf32>
    %584 = vector.extract_strided_slice %142 {offsets = [5, 0, 0], sizes = [1, 8, 128], strides = [1, 1, 1]} : vector<8x8x128xf32> to vector<1x8x128xf32>
    %585 = vector.shape_cast %584 : vector<1x8x128xf32> to vector<8x128xf32>
    %c3_199 = arith.constant 3 : index
    %c5_200 = arith.constant 5 : index
    %c0_201 = arith.constant 0 : index
    %c0_202 = arith.constant 0 : index
    %586 = vector.load %arg6[%c3_199, %c5_200, %c0_201, %c0_202] : memref<4x8x8x128xf32, #tpu.memory_space<vmem>>, vector<1x1x8x128xf32>
    %587 = vector.shape_cast %586 : vector<1x1x8x128xf32> to vector<8x128xf32>
    %588 = arith.mulf %585, %587 : vector<8x128xf32>
    %589 = arith.addf %577, %588 : vector<8x128xf32>
    %590 = vector.extract_strided_slice %142 {offsets = [6, 0, 0], sizes = [1, 8, 128], strides = [1, 1, 1]} : vector<8x8x128xf32> to vector<1x8x128xf32>
    %591 = vector.shape_cast %590 : vector<1x8x128xf32> to vector<8x128xf32>
    %592 = vector.extract_strided_slice %515 {offsets = [6, 0], sizes = [1, 128], strides = [1, 1]} : vector<8x128xf32> to vector<1x128xf32>
    %593 = vector.broadcast %592 : vector<1x128xf32> to vector<8x128xf32>
    %594 = arith.mulf %591, %593 : vector<8x128xf32>
    %595 = arith.addf %583, %594 : vector<8x128xf32>
    %596 = vector.extract_strided_slice %142 {offsets = [6, 0, 0], sizes = [1, 8, 128], strides = [1, 1, 1]} : vector<8x8x128xf32> to vector<1x8x128xf32>
    %597 = vector.shape_cast %596 : vector<1x8x128xf32> to vector<8x128xf32>
    %c3_203 = arith.constant 3 : index
    %c6_204 = arith.constant 6 : index
    %c0_205 = arith.constant 0 : index
    %c0_206 = arith.constant 0 : index
    %598 = vector.load %arg6[%c3_203, %c6_204, %c0_205, %c0_206] : memref<4x8x8x128xf32, #tpu.memory_space<vmem>>, vector<1x1x8x128xf32>
    %599 = vector.shape_cast %598 : vector<1x1x8x128xf32> to vector<8x128xf32>
    %600 = arith.mulf %597, %599 : vector<8x128xf32>
    %601 = arith.addf %589, %600 : vector<8x128xf32>
    %602 = vector.extract_strided_slice %142 {offsets = [7, 0, 0], sizes = [1, 8, 128], strides = [1, 1, 1]} : vector<8x8x128xf32> to vector<1x8x128xf32>
    %603 = vector.shape_cast %602 : vector<1x8x128xf32> to vector<8x128xf32>
    %604 = vector.extract_strided_slice %515 {offsets = [7, 0], sizes = [1, 128], strides = [1, 1]} : vector<8x128xf32> to vector<1x128xf32>
    %605 = vector.broadcast %604 : vector<1x128xf32> to vector<8x128xf32>
    %606 = arith.mulf %603, %605 : vector<8x128xf32>
    %607 = arith.addf %595, %606 : vector<8x128xf32>
    %608 = vector.extract_strided_slice %142 {offsets = [7, 0, 0], sizes = [1, 8, 128], strides = [1, 1, 1]} : vector<8x8x128xf32> to vector<1x8x128xf32>
    %609 = vector.shape_cast %608 : vector<1x8x128xf32> to vector<8x128xf32>
    %c3_207 = arith.constant 3 : index
    %c7_208 = arith.constant 7 : index
    %c0_209 = arith.constant 0 : index
    %c0_210 = arith.constant 0 : index
    %610 = vector.load %arg6[%c3_207, %c7_208, %c0_209, %c0_210] : memref<4x8x8x128xf32, #tpu.memory_space<vmem>>, vector<1x1x8x128xf32>
    %611 = vector.shape_cast %610 : vector<1x1x8x128xf32> to vector<8x128xf32>
    %612 = arith.mulf %609, %611 : vector<8x128xf32>
    %613 = arith.addf %601, %612 : vector<8x128xf32>
    %c4_i32_211 = arith.constant 4 : i32
    %614 = arith.muli %arg1, %c4_i32_211 : i32
    %c3_i32_212 = arith.constant 3 : i32
    %615 = arith.addi %614, %c3_i32_212 : i32
    %c3_i32_213 = arith.constant 3 : i32
    %616 = arith.muli %c3_i32_213, %615 : i32
    %c0_i32_214 = arith.constant 0 : i32
    %617 = arith.addi %616, %c0_i32_214 : i32
    %618 = arith.index_cast %617 : i32 to index
    %619 = memref.load %arg8[%618] : memref<48xf32, #tpu.memory_space<smem>>
    %620 = vector.broadcast %619 : f32 to vector<8x128xf32>
    %621 = arith.mulf %620, %607 : vector<8x128xf32>
    %c1_i32_215 = arith.constant 1 : i32
    %622 = arith.addi %616, %c1_i32_215 : i32
    %623 = arith.index_cast %622 : i32 to index
    %624 = memref.load %arg8[%623] : memref<48xf32, #tpu.memory_space<smem>>
    %625 = vector.broadcast %624 : f32 to vector<8x128xf32>
    %626 = arith.mulf %625, %613 : vector<8x128xf32>
    %627 = arith.addf %621, %626 : vector<8x128xf32>
    %628 = arith.mulf %627, %144 : vector<8x128xf32>
    %c2_i32_216 = arith.constant 2 : i32
    %629 = arith.addi %616, %c2_i32_216 : i32
    %630 = arith.index_cast %629 : i32 to index
    %631 = memref.load %arg8[%630] : memref<48xf32, #tpu.memory_space<smem>>
    %632 = vector.broadcast %631 : f32 to vector<8x128xf32>
    %633 = arith.addf %628, %632 : vector<8x128xf32>
    %c3_217 = arith.constant 3 : index
    %c0_218 = arith.constant 0 : index
    %c0_219 = arith.constant 0 : index
    %634 = vector.load %arg9[%c3_217, %c0_218, %c0_219] : memref<4x8x128xf32, #tpu.memory_space<vmem>>, vector<1x8x128xf32>
    %635 = vector.shape_cast %634 : vector<1x8x128xf32> to vector<8x128xf32>
    %636 = vector.shape_cast %633 : vector<8x128xf32> to vector<1x8x128xf32>
    tpu.vector_store %arg9[%c3_217, %c0_218, %c0_219], %636 {strides = array<i32>} : memref<4x8x128xf32, #tpu.memory_space<vmem>>, vector<1x8x128xf32>,
    return
  }
  func.func @transform_0(%arg0: i32, %arg1: i32) -> (i32, i32, i32) {
    %c0_i32 = arith.constant 0 : i32
    %c0_i32_0 = arith.constant 0 : i32
    return %arg1, %c0_i32, %arg0 : i32, i32, i32
  }
  func.func @transform_1(%arg0: i32, %arg1: i32) -> (i32, i32, i32, i32) {
    %c0_i32 = arith.constant 0 : i32
    %c0_i32_0 = arith.constant 0 : i32
    %c0_i32_1 = arith.constant 0 : i32
    %c0_i32_2 = arith.constant 0 : i32
    %c0_i32_3 = arith.constant 0 : i32
    return %c0_i32, %c0_i32_0, %c0_i32_1, %c0_i32_2 : i32, i32, i32, i32
  }
  func.func @transform_2(%arg0: i32, %arg1: i32) -> (i32, i32, i32, i32) {
    %c0_i32 = arith.constant 0 : i32
    %c0_i32_0 = arith.constant 0 : i32
    %c0_i32_1 = arith.constant 0 : i32
    %c0_i32_2 = arith.constant 0 : i32
    %c0_i32_3 = arith.constant 0 : i32
    return %c0_i32, %c0_i32_0, %c0_i32_1, %c0_i32_2 : i32, i32, i32, i32
  }
  func.func @transform_3(%arg0: i32, %arg1: i32) -> (i32, i32, i32, i32) {
    %c0_i32 = arith.constant 0 : i32
    %c0_i32_0 = arith.constant 0 : i32
    %c0_i32_1 = arith.constant 0 : i32
    %c0_i32_2 = arith.constant 0 : i32
    %c0_i32_3 = arith.constant 0 : i32
    return %c0_i32, %c0_i32_0, %c0_i32_1, %c0_i32_2 : i32, i32, i32, i32
  }
  func.func @transform_4(%arg0: i32, %arg1: i32) -> (i32, i32, i32, i32) {
    %c0_i32 = arith.constant 0 : i32
    %c0_i32_0 = arith.constant 0 : i32
    %c0_i32_1 = arith.constant 0 : i32
    %c0_i32_2 = arith.constant 0 : i32
    %c0_i32_3 = arith.constant 0 : i32
    return %c0_i32, %c0_i32_0, %c0_i32_1, %c0_i32_2 : i32, i32, i32, i32
  }
  func.func @transform_5(%arg0: i32, %arg1: i32) -> i32 {
    %c0_i32 = arith.constant 0 : i32
    %c0_i32_0 = arith.constant 0 : i32
    return %c0_i32 : i32
  }
  func.func @transform_6(%arg0: i32, %arg1: i32) -> i32 {
    %c0_i32 = arith.constant 0 : i32
    %c0_i32_0 = arith.constant 0 : i32
    return %c0_i32 : i32
  }
  func.func @transform_7(%arg0: i32, %arg1: i32) -> (i32, i32, i32) {
    %c0_i32 = arith.constant 0 : i32
    %c0_i32_0 = arith.constant 0 : i32
    return %arg1, %c0_i32, %arg0 : i32, i32, i32
  }
}

</mosaic_0001>

<bundles_post_ra>
// kernel: tpu_custom_call.1
= control target key start
LH: loop header
LB: loop body
LE: loop exit
PB: predicated region body
PF: predicated region fallthrough
CT: control target
= control target key end

     0   :  { %s2739_s0 = inlined_call_operand.hbm [shape: f32[32,8,512], index: 0, kind: input, shape index: {}]   ;;  %s2740_s1 = inlined_call_operand.hbm [shape: f32[2,8,8,128], index: 1, kind: input, shape index: {}]   ;;  %s2741_s2 = inlined_call_operand.hbm [shape: f32[2,8,8,128], index: 2, kind: input, shape index: {}]   ;;  %s2742_s3 = inlined_call_operand.hbm [shape: f32[2,8,8,128], index: 3, kind: input, shape index: {}]   ;;  %s2743_s4 = inlined_call_operand.hbm [shape: f32[4,8,8,128], index: 4, kind: input, shape index: {}]   ;;  %s2744_s5 = inlined_call_operand.vmem [shape: f32[16], index: 5, kind: input, shape index: {}]   ;;  %s2745_s6 = inlined_call_operand.vmem [shape: f32[48], index: 6, kind: input, shape index: {}]   ;;  %s2746_s7 = inlined_call_operand.hbm [shape: f32[16,8,512], index: 7, kind: output, shape index: {}]  }
   0x1   :  { %2753 = sst [smem:[#allocation25_spill]] %s2740_s1 }
   0x2   :  { %2754 = sst [smem:[#allocation26_spill]] %s2741_s2 }
   0x3   :  { %2755 = sst [smem:[#allocation27_spill]] %s2742_s3 }
   0x4   :  { %2756 = sst [smem:[#allocation28_spill]] %s2743_s4 }
   0x5   :  { %2757 = sst [smem:[#allocation29_spill]] %s2744_s5 }
   0x6   :  { %2758 = sst [smem:[#allocation30_spill]] %s2745_s6 }
   0x7   :  { %12 = vsyncpa [#allocation3], 0 }
   0x8   :  { %14 = vsyncpa [#allocation3 + $0x1], 0 }
   0x9   :  { %15 = vsyncpa [#allocation7], 0 }
   0xa   :  { %16 = vsyncpa [#allocation10], 0 }
   0xb   :  { %17 = vsyncpa [#allocation5], 0 }
   0xc   :  { %18 = vsyncpa [#allocation14], 0 }
   0xd   :  { %19 = vsyncpa [#allocation4], 0 }
   0xe   :  { %21 = vsyncpa [#allocation4 + $0x1], 0  ;;  %s1931_s24 = smov 0   ;;  %s1933_s25 = smov 0  }
   0xf   :  { %s1935_s26 = smov 0   ;;  %s1937_s27 = smov 0  }
  0x10   :  { %s1939_s28 = smov 0   ;;  %s1941_s29 = smov 0  }
  0x11   :  { %s1943_s30 = smov 0   ;;  %s1945_s8 = smov 0  }
  0x12 LB: > { %2759 = sst [smem:[#allocation22_spill]] %s1869_s29  ;;  %s2747_s9 = sadd.s32 4294967295, %s1877_s8   ;;  %s1877_s8 = sphi %s1945_s8, %s27_s8   ;;  %s1873_s30 = sphi %s1943_s30, %s2789_s30   ;;  %s1869_s29 = sphi %s1941_s29, %s2783_s29   ;;  %s1865_s28 = sphi %s1939_s28, %s2788_s28   ;;  %s1861_s27 = sphi %s1937_s27, %s2782_s27   ;;  %s1857_s26 = sphi %s1935_s26, %s2787_s26   ;;  %s1853_s25 = sphi %s1933_s25, %s2786_s25   ;;  %s1849_s24 = sphi %s1931_s24, %s2785_s24  }
  0x13   : > { %p1380_p0 = scmp.ge.s32.totalorder %s1877_s8, 1  ;;  %p1975_p1 = scmp.eq.s32.totalorder %s2747_s9, 0 }
  0x14   : > { %p226_p2 = scmp.lt.s32.totalorder %s1877_s8, 17  ;;  %s2761_s1 = sld [smem:[#allocation25_spill]] }
  0x15   : > { %s1879_s15 = smov [#allocation6]   ;;  %s2764_s3 = sld [smem:[#allocation27_spill]] }
  0x16   : > { %p1983_p3 = pnand %p1380_p0, %p226_p2  ;;  %s239_s16 = sshll.u32 %s1879_s15, 4  ;;  %s240_s16 = int_to_ptr.vmem [resolvable:$true] %s239_s16 }
  0x17   : > { %s2748_s21 = smov 128   ;;  %s2749_s22 = smov 8  }
  0x18   : > { %p1448_p4 = pneg %p1983_p3  ;;  %s1882_s23 = smov [#allocation9]  }
  0x19   : > { %s267_s11 = sshll.u32 %s1882_s23, 4  ;;  %s2765_s2 = sld [smem:[#allocation26_spill]]  ;;  %s268_s11 = int_to_ptr.vmem [resolvable:$true] %s267_s11 }
  0x1a   : > { %s237_s13 = sshll.u32 %s2761_s1, 4  ;;  %p1991_p5 = pnand %p1448_p4, %p1975_p1  ;;  %s238_s13 = int_to_ptr.hbm [resolvable:$true] %s237_s13 }
  0x1b   : > { %s265_s20 = sshll.u32 %s2764_s3, 4  ;;  %s2766_s4 = sld [smem:[#allocation28_spill]]  ;;  %s266_s20 = int_to_ptr.hbm [resolvable:$true] %s265_s20 }
  0x1c   : > { %1451 = dma.hbm_to_vmem [thread:$0]  (!%p1991_p5), %s238_s13, 2048, %s240_s16, [#allocation7], %s2748_s21, %s2748_s21, %s2749_s22  }
  0x1d   : > { %1457 = dma.hbm_to_vmem [thread:$0]  (!%p1991_p5), %s266_s20, 2048, %s268_s11, [#allocation10], %s2748_s21, %s2748_s21, %s2749_s22  }
  0x1e   : > { %s1883_s13 = smov [#allocation8]   ;;  %s1884_s23 = smov [#allocation11]  }
  0x1f   : > { %s251_s9 = sshll.u32 %s2765_s2, 4  ;;  %s253_s16 = sshll.u32 %s1883_s13, 4  ;;  %s252_s9 = int_to_ptr.hbm [resolvable:$true] %s251_s9  ;;  %s254_s16 = int_to_ptr.vmem [resolvable:$true] %s253_s16 }
  0x20   : > { %1454 = dma.hbm_to_vmem [thread:$0]  (!%p1991_p5), %s252_s9, 2048, %s254_s16, [#allocation7], %s2748_s21, %s2748_s21, %s2749_s22  }
  0x21   : > { %s279_s1 = sshll.u32 %s2766_s4, 4  ;;  %s281_s20 = sshll.u32 %s1884_s23, 4  ;;  %s280_s1 = int_to_ptr.hbm [resolvable:$true] %s279_s1  ;;  %s282_s20 = int_to_ptr.vmem [resolvable:$true] %s281_s20 }
  0x22   : > { %s2767_s5 = sld [smem:[#allocation29_spill]]  ;;  %s1885_s13 = smov [#allocation12]  }
  0x23   : > { %1460 = dma.hbm_to_vmem [thread:$0]  (!%p1991_p5), %s280_s1, 4096, %s282_s20, [#allocation10], %s2748_s21, %s2748_s21, %s2749_s22  }
  0x24   : > { %s2768_s6 = sld [smem:[#allocation30_spill]]  ;;  %s1886_s16 = smov [#allocation13]  }
  0x25   : > { %s1379_s23 = sadd.s32 4294967294, %s1877_s8   ;;  %s36_s11 = sadd.s32 1, %s1869_s29 }
  0x26   : > { %p37_p6 = scmp.ge.s32.totalorder %s36_s11, 4  ;;  %s39_s1 = sadd.s32 1, %s1873_s30 }
  0x27   : > { %s48_s20 = sadd.s32 1, %s1857_s26  ;;  %p55_p7 = scmp.ne.s32.totalorder %s1857_s26, %s1853_s25 }
  0x28   : > { %s294_s15 = sshll.u32 %s2767_s5, 4  ;;  %s2791_s11 = smov (%p37_p6, %s36_s11), 0  ;;  %s295_s15 = int_to_ptr.vmem [resolvable:$true] %s294_s15 }
  0x29   : > { %1463 = dma.vmem_to_smem (!%p1991_p5), %s295_s15, 16, %s1885_s13, [#allocation5]  }
  0x2a   : > { %s304_s19 = sshll.u32 %s2768_s6, 4  ;;  %2769 = sst [smem:[#allocation23_spill]] %s2791_s11  ;;  %s305_s19 = int_to_ptr.vmem [resolvable:$true] %s304_s19 }
  0x2b   : > { %1466 = dma.vmem_to_smem (!%p1991_p5), %s305_s19, 16, %s1886_s16, [#allocation14]  }
  0x2c   : > { %s2793_s1 = smov (!%p37_p6, %s39_s1), %s1873_s30  ;;  %s43_s12 = ssub.s32 %s1869_s29, %s2791_s11 }
  0x2d   : > { %p56_p8 = scmp.eq.s32.totalorder %s1877_s8, 0  ;;  %p41_p9 = scmp.ge.s32.totalorder %s2793_s1, 4 }
  0x2e   : > { %p61_p10 = scmp.ne.s32.totalorder %s1853_s25, %s1849_s24  ;;  %s2771_s15 = sadd.s32 4294967295, %s1877_s8  }
  0x2f   : > { %p2048_p11 = por %p56_p8, %p55_p7  ;;  %p213_p12 = scmp.eq.s32.totalorder %s2771_s15, 15 }
  0x30   : > { %s2795_s1 = smov (%p41_p9, %s2793_s1), 0  ;;  %p2058_p13 = por %p1975_p1, %p61_p10 }
  0x31   : > { %2772 = sst [smem:[#allocation24_spill]] %s2795_s1  ;;  %p2062_p0 = por %p213_p12, %p55_p7 }
  0x32   : > { %s44_s19 = ssub.s32 %s1873_s30, %s2795_s1  ;;  %p219_p2 = scmp.eq.s32.totalorder %s1379_s23, 15 }
  0x33   : > { %s45_s13 = sor.u32 %s44_s19, %s43_s12  ;;  %p1481_p4 = scmp.lt.s32.totalorder %s1877_s8, 16 }
  0x34   : > { %p46_p5 = scmp.eq.s32.totalorder %s45_s13, 0  ;;  %p2069_p6 = por %p219_p2, %p61_p10 }
  0x35   : > { %s315_s15 = sand.u32 1, %s1857_s26   ;;  %s1418_s21 = sshll.u32 %s1869_s29, 5 }
  0x36   : > { %s2076_s22 = scalar_select %p46_p5, %s1857_s26, %s48_s20  }
  0x37   : > { %s1388_s2 = sshll.u32 %s315_s15, 6  ;;  %s324_s3 = sadd.s32 %s1873_s30, %s1418_s21 }
  0x38   : > { %s1391_s4 = sshll.u32 %s324_s3, 3  ;;  %s319_s5 = scalar_lea.vmem [#allocation2], %s1388_s2 }
  0x39   : > { %s329_s6 = sshll.u32 %s319_s5, 4  ;;  %s326_s11 = scalar_lea.hbm %s2739_s0, %s1391_s4  ;;  %s330_s6 = int_to_ptr.vmem [resolvable:$true] %s329_s6 }
  0x3a   : > { %s327_s12 = sshll.u32 %s326_s11, 4  ;;  %p1468_p7 = pnand %p1481_p4, %p2048_p11  ;;  %s328_s12 = int_to_ptr.hbm [resolvable:$true] %s327_s12 }
  0x3b   : > { %s316_s19 = scalar_lea.sflag [#allocation3], %s315_s15  ;;  %s1887_s13 = smov 512  }
  0x3c   : > { %s2776_s29 = smov 8   ;;  %s2777_s20 = smov 128  }
  0x3d   : > { %1470 = dma.hbm_to_vmem [thread:$0]  (!%p1468_p7), %s328_s12, 1024, %s330_s6, %s316_s19, %s1887_s13, %s2777_s20, %s2776_s29  }
  0x3e   : > { %341 = sbr.rel (%p1983_p3) target bundleno = 241 (0xf1), region = 48  ;;  %s2091_s2 = sand.u32 (!%p1983_p3), 1, %s1853_s25  }
  0x3f   : > { %s1393_s3 = sshll.u32 (!%p1983_p3), %s2091_s2, 6  ;;  %s344_s4 = scalar_lea.sflag (!%p1983_p3), [#allocation3], %s2091_s2 }
  0x40   : > { %s2095_s5 = scalar_lea.vmem (!%p1983_p3), [#allocation2], %s1393_s3 }
  0x43   : > { %1824 = dma.done.wait (%p2058_p13), %s344_s4, 1024  }
  0x44   : > { %1826 = vsyncadd (%p2058_p13), %s344_s4, 4294966272 }
  0x45   : > { %1828 = dma.done.wait (%p1975_p1), [#allocation7], 4096  }
  0x46   : > { %1830 = vsyncadd (%p1975_p1), [#allocation7], 4294963200 }
  0x47   : > { %1832 = dma.done.wait (%p1975_p1), [#allocation10], 6144  }
  0x48   : > { %1834 = vsyncadd (%p1975_p1), [#allocation10], 4294961152 }
  0x49   : > { %1836 = dma.done.wait (%p1975_p1), [#allocation5], 16  }
  0x4a   : > { %1838 = vsyncadd (%p1975_p1), [#allocation5], 4294967280 }
  0x4b   : > { %1840 = dma.done.wait (%p1975_p1), [#allocation14], 16  }
  0x4c   : > { %1842 = vsyncadd (%p1975_p1), [#allocation14], 4294967280 }
  0x4d   : > { %383 = sfence }
  0x4e   : > { %v412_v0 = vld [vmem:[%s2095_s5] sm:$0xff]  ;;  %v1401_v1 = vld [vmem:[%s2095_s5 + $0x10] sm:$0xff]  ;;  %v416_v3 = vld [vmem:[#allocation6 + $0x8] sm:$0xff]  ;;  %s2322_s6 = sshll.u32 %s1861_s27, 2  ;;  %s2399_s9 = smul.u32 12, %s1861_s27 }
  0x4f   : > { %v415_v2 = vld [vmem:[#allocation6] sm:$0xff]  ;;  %v417_v4 = vld [vmem:[#allocation6 + $0x10] sm:$0xff]  ;;  %v418_v5 = vld [vmem:[#allocation6 + $0x18] sm:$0xff]  ;;  %v464_v7 = vrot.slane %v412_v0, 1  ;;  %v2121_v11 = vmul.f32 %v416_v3, %v412_v0  ;;  %v465_v14 = vrot.slane %v412_v0, 2  ;;  %v466_v21 = vrot.slane %v412_v0, 3 }
  0x50   : > { %v2119_v6 = vmul.f32 %v415_v2, %v412_v0  ;;  %v419_v8 = vld [vmem:[#allocation6 + $0x20] sm:$0xff]  ;;  %v420_v9 = vld [vmem:[#allocation6 + $0x28] sm:$0xff]  ;;  %v421_v10 = vld [vmem:[#allocation6 + $0x30] sm:$0xff]  ;;  %v2123_v12 = vmul.f32 %v417_v4, %v412_v0  ;;  %v2125_v13 = vmul.f32 %v418_v5, %v412_v0  ;;  %v467_v27 = vrot.slane %v412_v0, 4  ;;  %s808_s29 = sadd.s32 1, %s2322_s6  ;;  %s810_s10 = sadd.s32 2, %s2322_s6 }
  0x51   : > { %v422_v15 = vld [vmem:[#allocation6 + $0x38] sm:$0xff]  ;;  %v2127_v16 = vmul.f32 %v419_v8, %v412_v0  ;;  %v2129_v17 = vmul.f32 %v420_v9, %v412_v0  ;;  %v2131_v18 = vmul.f32 %v421_v10, %v412_v0  ;;  %v439_v19 = vld [vmem:[#allocation9] sm:$0xff]  ;;  %v440_v20 = vld [vmem:[#allocation9 + $0x8] sm:$0xff]  ;;  %v468_v28 = vrot.slane %v412_v0, 5  ;;  %s2339_s14 = sld [smem:[#allocation12 + %s2322_s6]]  ;;  %s812_s21 = sadd.s32 3, %s2322_s6 }
  0x52   : > { %v2133_v22 = vmul.f32 %v422_v15, %v412_v0  ;;  %v441_v23 = vld [vmem:[#allocation9 + $0x10] sm:$0xff]  ;;  %v442_v24 = vld [vmem:[#allocation9 + $0x18] sm:$0xff]  ;;  %v443_v25 = vld [vmem:[#allocation9 + $0x20] sm:$0xff]  ;;  %v2135_v26 = vmul.f32 %v1401_v1, %v439_v19  ;;  %v2137_v32 = vmul.f32 %v1401_v1, %v440_v20  ;;  %v469_v35 = vrot.slane %v412_v0, 6  ;;  %s2348_s11 = sld [smem:[#allocation12 + %s808_s29]]  ;;  %s2406_s15 = smul.u32 3, %s808_s29 }
  0x53   : > { %v444_v29 = vld [vmem:[#allocation9 + $0x28] sm:$0xff]  ;;  %v445_v30 = vld [vmem:[#allocation9 + $0x30] sm:$0xff]  ;;  %v446_v31 = vld [vmem:[#allocation9 + $0x38] sm:$0xff]  ;;  %v2139_v33 = vmul.f32 %v1401_v1, %v441_v23  ;;  %v2141_v34 = vmul.f32 %v1401_v1, %v442_v24  ;;  %v2143_v36 = vmul.f32 %v1401_v1, %v443_v25  ;;  %v470_v39 = vrot.slane %v412_v0, 7  ;;  %s2356_s1 = sld [smem:[#allocation12 + %s810_s10]]  ;;  %s979_s23 = sadd.s32 1, %s2399_s9 }
  0x54   : > { %v2145_v37 = vmul.f32 %v1401_v1, %v444_v29  ;;  %v2147_v38 = vmul.f32 %v1401_v1, %v445_v30  ;;  %v471_v40 = vld [vmem:[#allocation8] sm:$0xff]  ;;  %v472_v41 = vld [vmem:[#allocation8 + $0x8] sm:$0xff]  ;;  %v473_v42 = vld [vmem:[#allocation8 + $0x10] sm:$0xff]  ;;  %v2149_v43 = vmul.f32 %v1401_v1, %v446_v31  ;;  %v479_v47 = vperm.slane %v412_v0, 0  ;;  %s2360_s17 = sld [smem:[#allocation12 + %s812_s21]]  ;;  %s1052_s19 = sadd.s32 1, %s2406_s15 }
  0x55   : > { %v474_v44 = vld [vmem:[#allocation8 + $0x18] sm:$0xff]  ;;  %v475_v45 = vld [vmem:[#allocation8 + $0x20] sm:$0xff]  ;;  %v476_v46 = vld [vmem:[#allocation8 + $0x28] sm:$0xff]  ;;  %v480_v48 = vperm.slane %v464_v7, 0  ;;  %v481_v49 = vperm.slane %v465_v14, 0  ;;  %v482_v52 = vperm.slane %v466_v21, 0 }
  0x56   : > { %v477_v50 = vld [vmem:[#allocation8 + $0x30] sm:$0xff]  ;;  %v478_v51 = vld [vmem:[#allocation8 + $0x38] sm:$0xff]  ;;  %v483_v53 = vperm.slane %v467_v27, 0  ;;  %v484_v54 = vperm.slane %v468_v28, 0  ;;  %v485_v55 = vperm.slane %v469_v35, 0  ;;  %v486_v56 = vperm.slane %v470_v39, 0 }
  0x57   : > { %v2151_v57 = vmul.f32 %v479_v47, %v471_v40  ;;  %v2153_v58 = vmul.f32 %v480_v48, %v472_v41  ;;  %v2155_v59 = vmul.f32 %v481_v49, %v473_v42  ;;  %v2158_v60 = vld [vmem:[%s2095_s5 + $0x8] sm:$0xff]  ;;  %v516_v61 = vld [vmem:[#allocation6 + $0x40] sm:$0xff]  ;;  %v2160_v62 = vmul.f32 %v482_v52, %v474_v44  ;;  %v1403_v2 = vld [vmem:[%s2095_s5 + $0x18] sm:$0xff]  ;;  %s2417_s12 = sld [smem:[#allocation13 + %s2399_s9]]  ;;  %s985_s4 = sadd.s32 2, %s2399_s9 }
  0x58   : > { %v2162_v63 = vmul.f32 %v483_v53, %v475_v45  ;;  %v2164_v0 = vmul.f32 %v484_v54, %v476_v46  ;;  %v2166_v1 = vmul.f32 %v485_v55, %v477_v50  ;;  %v517_v3 = vld [vmem:[#allocation6 + $0x48] sm:$0xff]  ;;  %v518_v4 = vld [vmem:[#allocation6 + $0x50] sm:$0xff]  ;;  %v519_v5 = vld [vmem:[#allocation6 + $0x58] sm:$0xff]  ;;  %v2169_v7 = vmul.f32 %v486_v56, %v478_v51  ;;  %s2421_s13 = sld [smem:[#allocation13 + %s979_s23]]  ;;  %s1058_s29 = sadd.s32 2, %s2406_s15 }
  0x59   : > { %v520_v8 = vld [vmem:[#allocation6 + $0x60] sm:$0xff]  ;;  %v521_v9 = vld [vmem:[#allocation6 + $0x68] sm:$0xff]  ;;  %v522_v10 = vld [vmem:[#allocation6 + $0x70] sm:$0xff]  ;;  %v524_v14 = vmul.f32 %v2158_v60, %v516_v61  ;;  %v525_v15 = vmul.f32 %v2158_v60, %v517_v3  ;;  %v526_v19 = vmul.f32 %v2158_v60, %v518_v4  ;;  %v527_v21 = vmul.f32 %v2158_v60, %v519_v5  ;;  %s2427_s20 = sld [smem:[#allocation13 + %s2406_s15]]  ;;  %s2633_s15 = smul.u32 3, %s812_s21 }
  0x5a   : > { %v523_v20 = vld [vmem:[#allocation6 + $0x78] sm:$0xff]  ;;  %v528_v23 = vmul.f32 %v2158_v60, %v520_v8  ;;  %v529_v24 = vmul.f32 %v2158_v60, %v521_v9  ;;  %v530_v25 = vmul.f32 %v2158_v60, %v522_v10  ;;  %v541_v27 = vld [vmem:[#allocation9 + $0x40] sm:$0xff]  ;;  %v542_v28 = vld [vmem:[#allocation9 + $0x48] sm:$0xff]  ;;  %v569_v5 = vrot.slane %v2158_v60, 4  ;;  %s2431_s3 = sld [smem:[#allocation13 + %s1052_s19]] }
  0x5b   : > { %v531_v29 = vmul.f32 %v2158_v60, %v523_v20  ;;  %v2180_v30 = vadd.f32 %v524_v14, %v2119_v6  ;;  %v2183_v31 = vadd.f32 %v525_v15, %v2121_v11  ;;  %v2186_v35 = vadd.f32 %v526_v19, %v2123_v12  ;;  %v543_v39 = vld [vmem:[#allocation9 + $0x50] sm:$0xff]  ;;  %v544_v40 = vld [vmem:[#allocation9 + $0x58] sm:$0xff]  ;;  %v545_v41 = vld [vmem:[#allocation9 + $0x60] sm:$0xff]  ;;  %s1200_s6 = sadd.s32 1, %s2633_s15  ;;  %s2665_s21 = sld [smem:[#allocation13 + %s2633_s15]] }
  0x5c   : > { %v2189_v42 = vadd.f32 %v527_v21, %v2125_v13  ;;  %v2192_v44 = vadd.f32 %v528_v23, %v2127_v16  ;;  %v2195_v45 = vadd.f32 %v529_v24, %v2129_v17  ;;  %v2198_v6 = vadd.f32 %v530_v25, %v2131_v18  ;;  %v546_v11 = vld [vmem:[#allocation9 + $0x68] sm:$0xff]  ;;  %v547_v46 = vld [vmem:[#allocation9 + $0x70] sm:$0xff]  ;;  %v548_v47 = vld [vmem:[#allocation9 + $0x78] sm:$0xff]  ;;  %s2668_s19 = sld [smem:[#allocation13 + %s1200_s6]] }
  0x5d   : > { %v2201_v12 = vadd.f32 %v531_v29, %v2133_v22  ;;  %v549_v48 = vmul.f32 %v1403_v2, %v541_v27  ;;  %v550_v49 = vmul.f32 %v1403_v2, %v542_v28  ;;  %v551_v50 = vmul.f32 %v1403_v2, %v543_v39  ;;  %v575_v3 = vld [vmem:[#allocation8 + $0x48] sm:$0xff]  ;;  %v576_v4 = vld [vmem:[#allocation8 + $0x50] sm:$0xff]  ;;  %v578_v9 = vld [vmem:[#allocation8 + $0x60] sm:$0xff] }
  0x5e   : > { %v552_v13 = vmul.f32 %v1403_v2, %v544_v40  ;;  %v553_v51 = vmul.f32 %v1403_v2, %v545_v41  ;;  %v554_v52 = vmul.f32 %v1403_v2, %v546_v11  ;;  %v555_v16 = vmul.f32 %v1403_v2, %v547_v46  ;;  %v580_v10 = vld [vmem:[#allocation8 + $0x70] sm:$0xff]  ;;  %v581_v14 = vld [vmem:[#allocation8 + $0x78] sm:$0xff] }
  0x5f   : > { %v556_v53 = vmul.f32 %v1403_v2, %v548_v47  ;;  %v2204_v17 = vadd.f32 %v549_v48, %v2135_v26  ;;  %v2207_v18 = vadd.f32 %v550_v49, %v2137_v32  ;;  %v2210_v54 = vadd.f32 %v551_v50, %v2139_v33  ;;  %v574_v26 = vld [vmem:[#allocation8 + $0x40] sm:$0xff] }
  0x60   : > { %v2213_v22 = vadd.f32 %v552_v13, %v2141_v34  ;;  %v2216_v55 = vadd.f32 %v553_v51, %v2143_v36  ;;  %v2219_v56 = vadd.f32 %v554_v52, %v2145_v37  ;;  %v2222_v61 = vadd.f32 %v555_v16, %v2147_v38  ;;  %v577_v36 = vld [vmem:[#allocation8 + $0x58] sm:$0xff] }
  0x61   : > { %v2225_v2 = vadd.f32 %v556_v53, %v2149_v43  ;;  %v566_v32 = vrot.slane %v2158_v60, 1  ;;  %v567_v33 = vrot.slane %v2158_v60, 2  ;;  %v568_v34 = vrot.slane %v2158_v60, 3  ;;  %v579_v43 = vld [vmem:[#allocation8 + $0x68] sm:$0xff] }
  0x62   : > { %v570_v37 = vrot.slane %v2158_v60, 5  ;;  %v571_v38 = vrot.slane %v2158_v60, 6  ;;  %v572_v8 = vrot.slane %v2158_v60, 7  ;;  %v582_v15 = vperm.slane %v2158_v60, 0 }
  0x63   : > { %v583_v19 = vperm.slane %v566_v32, 0  ;;  %v584_v20 = vperm.slane %v567_v33, 0  ;;  %v585_v21 = vperm.slane %v568_v34, 0  ;;  %v586_v23 = vperm.slane %v569_v5, 0 }
  0x64   : > { %v587_v24 = vperm.slane %v570_v37, 0  ;;  %v588_v25 = vperm.slane %v571_v38, 0  ;;  %v589_v27 = vperm.slane %v572_v8, 0  ;;  %v598_v28 = vmul.f32 %v582_v15, %v574_v26 }
  0x65   : > { %v599_v29 = vmul.f32 %v583_v19, %v575_v3  ;;  %v600_v39 = vmul.f32 %v584_v20, %v576_v4  ;;  %v601_v40 = vmul.f32 %v585_v21, %v577_v36  ;;  %v602_v41 = vmul.f32 %v586_v23, %v578_v9 }
  0x66   : > { %v603_v11 = vmul.f32 %v587_v24, %v579_v43  ;;  %v604_v46 = vmul.f32 %v588_v25, %v580_v10  ;;  %v605_v47 = vmul.f32 %v589_v27, %v581_v14  ;;  %v606_v48 = vadd.f32 %v598_v28, %v2151_v57 }
  0x67   : > { %v607_v49 = vadd.f32 %v599_v29, %v2153_v58  ;;  %v608_v60 = vadd.f32 %v600_v39, %v2155_v59  ;;  %v2239_v50 = vadd.f32 %v601_v40, %v2160_v62  ;;  %v2242_v13 = vadd.f32 %v602_v41, %v2162_v63 }
  0x68   : > { %v2245_v51 = vadd.f32 %v603_v11, %v2164_v0  ;;  %v2248_v52 = vadd.f32 %v604_v46, %v2166_v1  ;;  %v2251_v16 = vadd.f32 %v605_v47, %v2169_v7  ;;  %v614_v57 = vperm.slane %v2204_v17, 0 }
  0x69   : > { %v615_v58 = vperm.slane %v2207_v18, 0  ;;  %v616_v59 = vperm.slane %v2210_v54, 0  ;;  %v617_v62 = vperm.slane %v2213_v22, 0  ;;  %v618_v63 = vperm.slane %v2216_v55, 0 }
  0x6a   : > { %v619_v53 = vperm.slane %v2219_v56, 0  ;;  %v620_v0 = vperm.slane %v2222_v61, 0  ;;  %v621_v1 = vperm.slane %v2225_v2, 0  ;;  %v622_v26 = vmul.f32 %v614_v57, %v606_v48 }
  0x6b   : > { %v623_v32 = vmul.f32 %v615_v58, %v606_v48  ;;  %v624_v7 = vmul.f32 %v616_v59, %v606_v48  ;;  %v625_v33 = vmul.f32 %v617_v62, %v606_v48  ;;  %v626_v34 = vmul.f32 %v618_v63, %v606_v48 }
  0x6c   : > { %v627_v3 = vmul.f32 %v619_v53, %v606_v48  ;;  %v628_v4 = vmul.f32 %v620_v0, %v606_v48  ;;  %v629_v36 = vmul.f32 %v621_v1, %v606_v48  ;;  %v638_v5 = vperm.slane %v2204_v17, 1 }
  0x6d   : > { %v639_v37 = vperm.slane %v2207_v18, 1  ;;  %v640_v38 = vperm.slane %v2210_v54, 1  ;;  %v641_v8 = vperm.slane %v2213_v22, 1  ;;  %v642_v9 = vperm.slane %v2216_v55, 1 }
  0x6e   : > { %v643_v43 = vperm.slane %v2219_v56, 1  ;;  %v644_v10 = vperm.slane %v2222_v61, 1  ;;  %v645_v14 = vperm.slane %v2225_v2, 1  ;;  %v646_v15 = vmul.f32 %v638_v5, %v607_v49 }
  0x6f   : > { %v647_v19 = vmul.f32 %v639_v37, %v607_v49  ;;  %v648_v20 = vmul.f32 %v640_v38, %v607_v49  ;;  %v649_v21 = vmul.f32 %v641_v8, %v607_v49  ;;  %v650_v23 = vmul.f32 %v642_v9, %v607_v49 }
  0x70   : > { %v651_v24 = vmul.f32 %v643_v43, %v607_v49  ;;  %v652_v25 = vmul.f32 %v644_v10, %v607_v49  ;;  %v653_v27 = vmul.f32 %v645_v14, %v607_v49  ;;  %v654_v28 = vadd.f32 %v646_v15, %v622_v26 }
  0x71   : > { %v655_v29 = vadd.f32 %v647_v19, %v623_v32  ;;  %v656_v39 = vadd.f32 %v648_v20, %v624_v7  ;;  %v657_v40 = vadd.f32 %v649_v21, %v625_v33  ;;  %v658_v41 = vadd.f32 %v650_v23, %v626_v34 }
  0x72   : > { %v659_v11 = vadd.f32 %v651_v24, %v627_v3  ;;  %v660_v46 = vadd.f32 %v652_v25, %v628_v4  ;;  %v661_v47 = vadd.f32 %v653_v27, %v629_v36  ;;  %v662_v48 = vperm.slane %v2204_v17, 2 }
  0x73   : > { %v663_v57 = vperm.slane %v2207_v18, 2  ;;  %v664_v58 = vperm.slane %v2210_v54, 2  ;;  %v665_v59 = vperm.slane %v2213_v22, 2  ;;  %v666_v62 = vperm.slane %v2216_v55, 2 }
  0x74   : > { %v667_v49 = vperm.slane %v2219_v56, 2  ;;  %v668_v63 = vperm.slane %v2222_v61, 2  ;;  %v669_v53 = vperm.slane %v2225_v2, 2  ;;  %v670_v0 = vmul.f32 %v662_v48, %v608_v60 }
  0x75   : > { %v671_v1 = vmul.f32 %v663_v57, %v608_v60  ;;  %v672_v26 = vmul.f32 %v664_v58, %v608_v60  ;;  %v673_v32 = vmul.f32 %v665_v59, %v608_v60  ;;  %v674_v7 = vmul.f32 %v666_v62, %v608_v60 }
  0x76   : > { %v675_v33 = vmul.f32 %v667_v49, %v608_v60  ;;  %v676_v34 = vmul.f32 %v668_v63, %v608_v60  ;;  %v677_v3 = vmul.f32 %v669_v53, %v608_v60  ;;  %v678_v4 = vadd.f32 %v670_v0, %v654_v28 }
  0x77   : > { %v679_v36 = vadd.f32 %v671_v1, %v655_v29  ;;  %v680_v5 = vadd.f32 %v672_v26, %v656_v39  ;;  %v681_v37 = vadd.f32 %v673_v32, %v657_v40  ;;  %v682_v38 = vadd.f32 %v674_v7, %v658_v41 }
  0x78   : > { %v683_v8 = vadd.f32 %v675_v33, %v659_v11  ;;  %v684_v9 = vadd.f32 %v676_v34, %v660_v46  ;;  %v685_v43 = vadd.f32 %v677_v3, %v661_v47  ;;  %v686_v10 = vperm.slane %v2204_v17, 3 }
  0x79   : > { %v687_v14 = vperm.slane %v2207_v18, 3  ;;  %v688_v15 = vperm.slane %v2210_v54, 3  ;;  %v689_v19 = vperm.slane %v2213_v22, 3  ;;  %v690_v20 = vperm.slane %v2216_v55, 3 }
  0x7a   : > { %v691_v60 = vperm.slane %v2219_v56, 3  ;;  %v692_v21 = vperm.slane %v2222_v61, 3  ;;  %v693_v23 = vperm.slane %v2225_v2, 3  ;;  %v694_v24 = vmul.f32 %v686_v10, %v2239_v50 }
  0x7b   : > { %v695_v25 = vmul.f32 %v687_v14, %v2239_v50  ;;  %v696_v27 = vmul.f32 %v688_v15, %v2239_v50  ;;  %v697_v28 = vmul.f32 %v689_v19, %v2239_v50  ;;  %v698_v29 = vmul.f32 %v690_v20, %v2239_v50 }
  0x7c   : > { %v699_v39 = vmul.f32 %v691_v60, %v2239_v50  ;;  %v700_v40 = vmul.f32 %v692_v21, %v2239_v50  ;;  %v701_v41 = vmul.f32 %v693_v23, %v2239_v50  ;;  %v702_v11 = vadd.f32 %v694_v24, %v678_v4 }
  0x7d   : > { %v703_v46 = vadd.f32 %v695_v25, %v679_v36  ;;  %v704_v47 = vadd.f32 %v696_v27, %v680_v5  ;;  %v705_v48 = vadd.f32 %v697_v28, %v681_v37  ;;  %v706_v57 = vadd.f32 %v698_v29, %v682_v38 }
  0x7e   : > { %v707_v58 = vadd.f32 %v699_v39, %v683_v8  ;;  %v708_v59 = vadd.f32 %v700_v40, %v684_v9  ;;  %v709_v62 = vadd.f32 %v701_v41, %v685_v43  ;;  %v710_v49 = vperm.slane %v2204_v17, 4 }
  0x7f   : > { %v711_v63 = vperm.slane %v2207_v18, 4  ;;  %v712_v53 = vperm.slane %v2210_v54, 4  ;;  %v713_v0 = vperm.slane %v2213_v22, 4  ;;  %v714_v1 = vperm.slane %v2216_v55, 4 }
  0x80   : > { %v715_v50 = vperm.slane %v2219_v56, 4  ;;  %v716_v26 = vperm.slane %v2222_v61, 4  ;;  %v717_v32 = vperm.slane %v2225_v2, 4  ;;  %v718_v7 = vmul.f32 %v710_v49, %v2242_v13 }
  0x81   : > { %v719_v33 = vmul.f32 %v711_v63, %v2242_v13  ;;  %v720_v34 = vmul.f32 %v712_v53, %v2242_v13  ;;  %v721_v3 = vmul.f32 %v713_v0, %v2242_v13  ;;  %v722_v4 = vmul.f32 %v714_v1, %v2242_v13 }
  0x82   : > { %v723_v36 = vmul.f32 %v715_v50, %v2242_v13  ;;  %v724_v5 = vmul.f32 %v716_v26, %v2242_v13  ;;  %v725_v37 = vmul.f32 %v717_v32, %v2242_v13  ;;  %v726_v38 = vadd.f32 %v718_v7, %v702_v11 }
  0x83   : > { %v727_v8 = vadd.f32 %v719_v33, %v703_v46  ;;  %v728_v9 = vadd.f32 %v720_v34, %v704_v47  ;;  %v729_v43 = vadd.f32 %v721_v3, %v705_v48  ;;  %v730_v10 = vadd.f32 %v722_v4, %v706_v57 }
  0x84   : > { %v731_v14 = vadd.f32 %v723_v36, %v707_v58  ;;  %v732_v15 = vadd.f32 %v724_v5, %v708_v59  ;;  %v733_v19 = vadd.f32 %v725_v37, %v709_v62  ;;  %v734_v20 = vperm.slane %v2204_v17, 5 }
  0x85   : > { %v735_v60 = vperm.slane %v2207_v18, 5  ;;  %v736_v21 = vperm.slane %v2210_v54, 5  ;;  %v737_v23 = vperm.slane %v2213_v22, 5  ;;  %v738_v24 = vperm.slane %v2216_v55, 5 }
  0x86   : > { %v739_v13 = vperm.slane %v2219_v56, 5  ;;  %v740_v25 = vperm.slane %v2222_v61, 5  ;;  %v741_v27 = vperm.slane %v2225_v2, 5  ;;  %v742_v28 = vmul.f32 %v734_v20, %v2245_v51 }
  0x87   : > { %v743_v29 = vmul.f32 %v735_v60, %v2245_v51  ;;  %v744_v39 = vmul.f32 %v736_v21, %v2245_v51  ;;  %v745_v40 = vmul.f32 %v737_v23, %v2245_v51  ;;  %v746_v41 = vmul.f32 %v738_v24, %v2245_v51 }
  0x88   : > { %v747_v11 = vmul.f32 %v739_v13, %v2245_v51  ;;  %v748_v46 = vmul.f32 %v740_v25, %v2245_v51  ;;  %v749_v47 = vmul.f32 %v741_v27, %v2245_v51  ;;  %v750_v48 = vadd.f32 %v742_v28, %v726_v38 }
  0x89   : > { %v751_v57 = vadd.f32 %v743_v29, %v727_v8  ;;  %v752_v58 = vadd.f32 %v744_v39, %v728_v9  ;;  %v753_v59 = vadd.f32 %v745_v40, %v729_v43  ;;  %v754_v62 = vadd.f32 %v746_v41, %v730_v10 }
  0x8a   : > { %v755_v49 = vadd.f32 %v747_v11, %v731_v14  ;;  %v756_v63 = vadd.f32 %v748_v46, %v732_v15  ;;  %v757_v53 = vadd.f32 %v749_v47, %v733_v19  ;;  %v758_v0 = vperm.slane %v2204_v17, 6 }
  0x8b   : > { %v759_v1 = vperm.slane %v2207_v18, 6  ;;  %v760_v50 = vperm.slane %v2210_v54, 6  ;;  %v761_v51 = vperm.slane %v2213_v22, 6  ;;  %v762_v26 = vperm.slane %v2216_v55, 6 }
  0x8c   : > { %v763_v32 = vperm.slane %v2219_v56, 6  ;;  %v764_v7 = vperm.slane %v2222_v61, 6  ;;  %v765_v33 = vperm.slane %v2225_v2, 6  ;;  %v766_v34 = vmul.f32 %v758_v0, %v2248_v52 }
  0x8d   : > { %v767_v3 = vmul.f32 %v759_v1, %v2248_v52  ;;  %v768_v4 = vmul.f32 %v760_v50, %v2248_v52  ;;  %v769_v36 = vmul.f32 %v761_v51, %v2248_v52  ;;  %v770_v5 = vmul.f32 %v762_v26, %v2248_v52 }
  0x8e   : > { %v771_v37 = vmul.f32 %v763_v32, %v2248_v52  ;;  %v772_v38 = vmul.f32 %v764_v7, %v2248_v52  ;;  %v773_v8 = vmul.f32 %v765_v33, %v2248_v52  ;;  %v774_v9 = vadd.f32 %v766_v34, %v750_v48 }
  0x8f   : > { %v775_v43 = vadd.f32 %v767_v3, %v751_v57  ;;  %v776_v10 = vadd.f32 %v768_v4, %v752_v58  ;;  %v777_v14 = vadd.f32 %v769_v36, %v753_v59  ;;  %v778_v15 = vadd.f32 %v770_v5, %v754_v62 }
  0x90   : > { %v779_v19 = vadd.f32 %v771_v37, %v755_v49  ;;  %v780_v20 = vadd.f32 %v772_v38, %v756_v63  ;;  %v781_v60 = vadd.f32 %v773_v8, %v757_v53  ;;  %v782_v21 = vperm.slane %v2204_v17, 7 }
  0x91   : > { %v783_v23 = vperm.slane %v2207_v18, 7  ;;  %v784_v52 = vperm.slane %v2210_v54, 7  ;;  %v785_v24 = vperm.slane %v2213_v22, 7  ;;  %v786_v13 = vperm.slane %v2216_v55, 7 }
  0x92   : > { %v787_v25 = vperm.slane %v2219_v56, 7  ;;  %v788_v27 = vperm.slane %v2222_v61, 7  ;;  %v789_v28 = vperm.slane %v2225_v2, 7  ;;  %v790_v29 = vmul.f32 %v782_v21, %v2251_v16 }
  0x93   : > { %v791_v39 = vmul.f32 %v783_v23, %v2251_v16  ;;  %v792_v40 = vmul.f32 %v784_v52, %v2251_v16  ;;  %v793_v41 = vmul.f32 %v785_v24, %v2251_v16  ;;  %v794_v11 = vmul.f32 %v786_v13, %v2251_v16 }
  0x94   : > { %v795_v46 = vmul.f32 %v787_v25, %v2251_v16  ;;  %v796_v47 = vmul.f32 %v788_v27, %v2251_v16  ;;  %v797_v48 = vmul.f32 %v789_v28, %v2251_v16  ;;  %v798_v57 = vadd.f32 %v790_v29, %v774_v9 }
  0x95   : > { %v799_v58 = vadd.f32 %v791_v39, %v775_v43  ;;  %v800_v59 = vadd.f32 %v792_v40, %v776_v10  ;;  %v801_v62 = vadd.f32 %v793_v41, %v777_v14  ;;  %v802_v49 = vadd.f32 %v794_v11, %v778_v15 }
  0x96   : > { %v803_v63 = vadd.f32 %v795_v46, %v779_v19  ;;  %v804_v53 = vadd.f32 %v796_v47, %v780_v20  ;;  %v805_v0 = vadd.f32 %v797_v48, %v781_v60  ;;  %v814_v1 = vstv %s2339_s14  ;;  %s2540_s14 = sld [smem:[#allocation13 + %s1058_s29]] }
  0x97   : > { %v823_v50 = vstv %s2348_s11  ;;  %v840_v51 = vstv %s2356_s1  ;;  %v857_v26 = vstv %s2360_s17  ;;  %v815_v32 = vmul.f32 %v814_v1, %v798_v57  ;;  %v2402_v57 = vld [vmem:[%s2095_s5 + $0x20] sm:$0xff]  ;;  %s2547_s11 = smul.u32 3, %s810_s10 }
  0x98   : > { %v816_v7 = vmul.f32 %v814_v1, %v799_v58  ;;  %v817_v33 = vmul.f32 %v814_v1, %v800_v59  ;;  %v818_v34 = vmul.f32 %v814_v1, %v801_v62  ;;  %v819_v3 = vmul.f32 %v814_v1, %v802_v49  ;;  %v2410_v62 = vld [vmem:[%s2095_s5 + $0x28] sm:$0xff] }
  0x99   : > { %v820_v4 = vmul.f32 %v814_v1, %v803_v63  ;;  %v821_v36 = vmul.f32 %v814_v1, %v804_v53  ;;  %v822_v16 = vmul.f32 %v814_v1, %v805_v0  ;;  %v824_v5 = vmul.f32 %v823_v50, %v2180_v30  ;;  %s1126_s10 = sadd.s32 1, %s2547_s11  ;;  %s2579_s1 = sld [smem:[#allocation13 + %s2547_s11]] }
  0x9a   : > { %v825_v37 = vmul.f32 %v823_v50, %v2183_v31  ;;  %v826_v38 = vmul.f32 %v823_v50, %v2186_v35  ;;  %v827_v8 = vmul.f32 %v823_v50, %v2189_v42  ;;  %v828_v9 = vmul.f32 %v823_v50, %v2192_v44  ;;  %s2589_s17 = sld [smem:[#allocation13 + %s1126_s10]]  ;;  %s1132_s9 = sadd.s32 2, %s2547_s11 }
  0x9b   : > { %v829_v43 = vmul.f32 %v823_v50, %v2195_v45  ;;  %v830_v10 = vmul.f32 %v823_v50, %v2198_v6  ;;  %v831_v14 = vmul.f32 %v823_v50, %v2201_v12  ;;  %v832_v15 = vadd.f32 %v824_v5, %v815_v32  ;;  %s2635_s23 = sld [smem:[#allocation13 + %s1132_s9]] }
  0x9c   : > { %v833_v19 = vadd.f32 %v825_v37, %v816_v7  ;;  %v834_v20 = vadd.f32 %v826_v38, %v817_v33  ;;  %v835_v60 = vadd.f32 %v827_v8, %v818_v34  ;;  %v836_v21 = vadd.f32 %v828_v9, %v819_v3  ;;  %v2434_v37 = vld [vmem:[%s2095_s5 + $0x30] sm:$0xff]  ;;  %v2437_v38 = vld [vmem:[%s2095_s5 + $0x38] sm:$0xff]  ;;  %s2524_s5 = sld [smem:[#allocation13 + %s985_s4]] }
  0x9d   : > { %v837_v30 = vadd.f32 %v829_v43, %v820_v4  ;;  %v838_v23 = vadd.f32 %v830_v10, %v821_v36  ;;  %v839_v31 = vadd.f32 %v831_v14, %v822_v16  ;;  %v841_v35 = vmul.f32 %v840_v51, %v2204_v17 }
  0x9e   : > { %v842_v42 = vmul.f32 %v840_v51, %v2207_v18  ;;  %v843_v44 = vmul.f32 %v840_v51, %v2210_v54  ;;  %v844_v45 = vmul.f32 %v840_v51, %v2213_v22  ;;  %v845_v6 = vmul.f32 %v840_v51, %v2216_v55 }
  0x9f   : > { %v846_v12 = vmul.f32 %v840_v51, %v2219_v56  ;;  %v847_v52 = vmul.f32 %v840_v51, %v2222_v61  ;;  %v848_v24 = vmul.f32 %v840_v51, %v2225_v2  ;;  %v849_v13 = vadd.f32 %v841_v35, %v832_v15 }
  0xa0   : > { %v850_v25 = vadd.f32 %v842_v42, %v833_v19  ;;  %v851_v27 = vadd.f32 %v843_v44, %v834_v20  ;;  %v852_v28 = vadd.f32 %v844_v45, %v835_v60  ;;  %v853_v17 = vadd.f32 %v845_v6, %v836_v21 }
  0xa1   : > { %v854_v29 = vadd.f32 %v846_v12, %v837_v30  ;;  %v855_v18 = vadd.f32 %v847_v52, %v838_v23  ;;  %v856_v54 = vadd.f32 %v848_v24, %v839_v31  ;;  %v858_v22 = vadd.f32 %v857_v26, %v849_v13  ;;  %v923_v24 = vld [vmem:[#allocation11] sm:$0xff] }
  0xa2   : > { %v859_v39 = vadd.f32 %v857_v26, %v850_v25  ;;  %v860_v55 = vadd.f32 %v857_v26, %v851_v27  ;;  %v861_v56 = vadd.f32 %v857_v26, %v852_v28  ;;  %v862_v40 = vadd.f32 %v857_v26, %v853_v17  ;;  %v930_v28 = vld [vmem:[#allocation11 + $0x8] sm:$0xff] }
  0xa3   : > { %v863_v61 = vadd.f32 %v857_v26, %v854_v29  ;;  %v864_v41 = vadd.f32 %v857_v26, %v855_v18  ;;  %v865_v2 = vadd.f32 %v857_v26, %v856_v54  ;;  %v920_v49 = vperm.slane %v2402_v57, 0 }
  0xa4   : > { %v866_v11 = vmax.f32 %v858_v22, %v862_v40  ;;  %v926_v53 = vperm.slane %v2402_v57, 1  ;;  %v933_v0 = vperm.slane %v2402_v57, 2  ;;  %v940_v1 = vperm.slane %v2402_v57, 3 }
  0xa5   : > { %v867_v46 = vmax.f32 %v859_v39, %v863_v61  ;;  %v868_v47 = vmax.f32 %v860_v55, %v864_v41  ;;  %v869_v48 = vmax.f32 %v861_v56, %v865_v2  ;;  %v947_v50 = vperm.slane %v2402_v57, 4 }
  0xa6   : > { %v992_v51 = vperm.slane %v2410_v62, 0  ;;  %v999_v26 = vperm.slane %v2410_v62, 1  ;;  %v1006_v32 = vperm.slane %v2410_v62, 2  ;;  %v1013_v16 = vperm.slane %v2410_v62, 3 }
  0xa7   : > { %v870_v58 = vmax.f32 %v866_v11, %v867_v46  ;;  %v871_v59 = vmax.f32 %v868_v47, %v869_v48  ;;  %v1020_v5 = vperm.slane %v2410_v62, 4  ;;  %v954_v19 = vperm.slane %v2402_v57, 5 }
  0xa8   : > { %v1027_v20 = vperm.slane %v2410_v62, 5  ;;  %v1066_v21 = vperm.slane %v2434_v37, 0  ;;  %v1073_v30 = vperm.slane %v2434_v37, 1  ;;  %v1080_v31 = vperm.slane %v2434_v37, 2 }
  0xa9   : > { %v872_v63 = vmax.f32 %v870_v58, %v871_v59  ;;  %v1140_v35 = vperm.slane %v2437_v38, 0  ;;  %v961_v44 = vperm.slane %v2402_v57, 6  ;;  %v1034_v45 = vperm.slane %v2410_v62, 6  ;;  %v944_v59 = vld [vmem:[#allocation11 + $0x18] sm:$0xff] }
  0xaa   : > { %v968_v12 = vperm.slane %v2402_v57, 7  ;;  %v1041_v52 = vperm.slane %v2410_v62, 7  ;;  %v977_v13 = vstv %s2417_s12  ;;  %v1087_v25 = vperm.slane %v2434_v37, 3  ;;  %s1400_s12 = sshll.u32 %s2091_s2, 5 }
  0xab   : > { %v873_v7 = vsub.f32 %v858_v22, %v872_v63  ;;  %v874_v33 = vsub.f32 %v859_v39, %v872_v63  ;;  %v875_v34 = vsub.f32 %v860_v55, %v872_v63  ;;  %v876_v3 = vsub.f32 %v861_v56, %v872_v63  ;;  %v937_v22 = vld [vmem:[#allocation11 + $0x10] sm:$0xff]  ;;  %v996_v39 = vld [vmem:[#allocation11 + $0x40] sm:$0xff] }
  0xac   : > { %v877_v4 = vsub.f32 %v862_v40, %v872_v63  ;;  %v878_v36 = vsub.f32 %v863_v61, %v872_v63  ;;  %v879_v8 = vsub.f32 %v864_v41, %v872_v63  ;;  %v880_v14 = vsub.f32 %v865_v2, %v872_v63  ;;  %v951_v63 = vld [vmem:[#allocation11 + $0x20] sm:$0xff] }
  0xad   : > { %v881_v9 = vmul.f32 1.442695, %v873_v7  ;;  %v883_v43 = vmul.f32 1.442695, %v874_v33  ;;  %v885_v10 = vmul.f32 1.442695, %v875_v34  ;;  %v981_v17 = vstv %s2421_s13 }
  0xae   : > { %v887_v15 = vmul.f32 1.442695, %v876_v3  ;;  %v889_v60 = vmul.f32 1.442695, %v877_v4  ;;  %v891_v23 = vmul.f32 1.442695, %v878_v36  ;;  %v1050_v29 = vstv %s2427_s20 }
  0xaf   : > { %1565 = vpow2.f32 %v881_v9  ;;  %v893_v42 = vmul.f32 1.442695, %v879_v8  ;;  %v895_v6 = vmul.f32 1.442695, %v880_v14  ;;  %v1094_v27 = vperm.slane %v2434_v37, 4  ;;  %s2672_s13 = scalar_lea.vmem [#allocation15], %s1400_s12 }
  0xb0   : > { %1567 = vpow2.f32 %v883_v43  ;;  %v1054_v18 = vstv %s2431_s3  ;;  %v1101_v55 = vperm.slane %v2434_v37, 5  ;;  %v1108_v56 = vperm.slane %v2434_v37, 6  ;;  %v958_v43 = vld [vmem:[#allocation11 + $0x28] sm:$0xff]  ;;  %s1419_s20 = sshll.u32 %s1861_s27, 4  ;;  %s1206_s3 = sadd.s32 2, %s2633_s15 }
  0xb1   : > { %1569 = vpow2.f32 %v885_v10  ;;  %v1115_v40 = vperm.slane %v2434_v37, 7  ;;  %v1147_v11 = vperm.slane %v2437_v38, 1  ;;  %v1003_v10 = vld [vmem:[#allocation11 + $0x48] sm:$0xff]  ;;  %v1128_v37 = vstv %s2589_s17  ;;  %s1224_s27 = sadd.s32 %s1865_s28, %s1419_s20  ;;  %s1207_s4 = sld [smem:[#allocation13 + %s1206_s3]] }
  0xb2   : > { %1571 = vpow2.f32 %v887_v15  ;;  %s1227_s11 = sshll.u32 %s2672_s13, 4  ;;  %s1783_s12 = scalar_lea.hbm %s2746_s7, 512  ;;  %s1228_s11 = int_to_ptr.vmem [resolvable:$true] %s1227_s11 }
  0xb3   : > { %1573 = vpow2.f32 %v889_v60 }
  0xb4   : > { %1575 = vpow2.f32 %v891_v23 }
  0xb5   : > { %v2455_v54 = vpop.eup %1565  ;;  %1577 = vpow2.f32 %v893_v42 }
  0xb6   : > { %v2460_v61 = vpop.eup %1567  ;;  %1579 = vpow2.f32 %v895_v6  ;;  %v921_v41 = vmul.f32 %v2455_v54, %v920_v49  ;;  %v924_v2 = vmul.f32 %v2455_v54, %v923_v24  ;;  %v993_v49 = vmul.f32 %v2455_v54, %v992_v51 }
  0xb7   : > { %v2467_v46 = vpop.eup %1569  ;;  %v897_v47 = vadd.f32 %v2460_v61, %v2455_v54  ;;  %v927_v48 = vmul.f32 %v2460_v61, %v926_v53  ;;  %v931_v58 = vmul.f32 %v2460_v61, %v930_v28  ;;  %v997_v3 = vmul.f32 %v2455_v54, %v996_v39  ;;  %v1010_v39 = vld [vmem:[#allocation11 + $0x50] sm:$0xff] }
  0xb8   : > { %v2478_v7 = vpop.eup %1571  ;;  %v934_v33 = vmul.f32 %v2467_v46, %v933_v0  ;;  %v938_v34 = vmul.f32 %v2467_v46, %v937_v22  ;;  %v1000_v53 = vmul.f32 %v2460_v61, %v999_v26  ;;  %v965_v0 = vld [vmem:[#allocation11 + $0x30] sm:$0xff]  ;;  %v972_v22 = vld [vmem:[#allocation11 + $0x38] sm:$0xff] }
  0xb9   : > { %v2488_v4 = vpop.eup %1573  ;;  %v898_v36 = vadd.f32 %v2467_v46, %v897_v47  ;;  %v928_v8 = vadd.f32 %v927_v48, %v921_v41  ;;  %v932_v51 = vadd.f32 %v931_v58, %v924_v2  ;;  %v941_v9 = vmul.f32 %v2478_v7, %v940_v1 }
  0xba   : > { %v2494_v14 = vpop.eup %1575  ;;  %v945_v15 = vmul.f32 %v2478_v7, %v944_v59  ;;  %v948_v26 = vmul.f32 %v2488_v4, %v947_v50  ;;  %v952_v60 = vmul.f32 %v2488_v4, %v951_v63  ;;  %v1001_v23 = vadd.f32 %v1000_v53, %v993_v49  ;;  %v1017_v49 = vld [vmem:[#allocation11 + $0x58] sm:$0xff] }
  0xbb   : > { %v2501_v42 = vpop.eup %1577  ;;  %v899_v6 = vadd.f32 %v2478_v7, %v898_v36  ;;  %v935_v1 = vadd.f32 %v934_v33, %v928_v8  ;;  %v939_v24 = vadd.f32 %v938_v34, %v932_v51  ;;  %v955_v28 = vmul.f32 %v2494_v14, %v954_v19  ;;  %v1024_v36 = vld [vmem:[#allocation11 + $0x60] sm:$0xff] }
  0xbc   : > { %v2507_v41 = vpop.eup %1579  ;;  %v959_v2 = vmul.f32 %v2494_v14, %v958_v43  ;;  %v962_v50 = vmul.f32 %v2501_v42, %v961_v44  ;;  %v966_v47 = vmul.f32 %v2501_v42, %v965_v0  ;;  %v1004_v48 = vmul.f32 %v2460_v61, %v1003_v10 }
  0xbd   : > { %v900_v58 = vadd.f32 %v2488_v4, %v899_v6  ;;  %v942_v59 = vadd.f32 %v941_v9, %v935_v1  ;;  %v946_v63 = vadd.f32 %v945_v15, %v939_v24  ;;  %v969_v19 = vmul.f32 %v2507_v41, %v968_v12  ;;  %v1031_v12 = vld [vmem:[#allocation11 + $0x68] sm:$0xff]  ;;  %v1038_v6 = vld [vmem:[#allocation11 + $0x70] sm:$0xff] }
  0xbe   : > { %v973_v33 = vmul.f32 %v2507_v41, %v972_v22  ;;  %v1005_v34 = vadd.f32 %v1004_v48, %v997_v3  ;;  %v1007_v44 = vmul.f32 %v2467_v46, %v1006_v32  ;;  %v1011_v53 = vmul.f32 %v2467_v46, %v1010_v39 }
  0xbf   : > { %v901_v8 = vadd.f32 %v2494_v14, %v900_v58  ;;  %v949_v51 = vadd.f32 %v948_v26, %v942_v59  ;;  %v953_v9 = vadd.f32 %v952_v60, %v946_v63  ;;  %v1014_v57 = vmul.f32 %v2478_v7, %v1013_v16  ;;  %v1045_v59 = vld [vmem:[#allocation11 + $0x78] sm:$0xff] }
  0xc0   : > { %v1008_v3 = vadd.f32 %v1007_v44, %v1001_v23  ;;  %v1012_v43 = vadd.f32 %v1011_v53, %v1005_v34  ;;  %v1018_v32 = vmul.f32 %v2478_v7, %v1017_v49  ;;  %v1021_v0 = vmul.f32 %v2488_v4, %v1020_v5  ;;  %v1070_v53 = vld [vmem:[#allocation11 + $0x80] sm:$0xff] }
  0xc1   : > { %v902_v10 = vadd.f32 %v2501_v42, %v901_v8  ;;  %v956_v15 = vadd.f32 %v955_v28, %v949_v51  ;;  %v960_v26 = vadd.f32 %v959_v2, %v953_v9  ;;  %v1025_v60 = vmul.f32 %v2488_v4, %v1024_v36  ;;  %v1077_v36 = vld [vmem:[#allocation11 + $0x88] sm:$0xff] }
  0xc2   : > { %v1015_v1 = vadd.f32 %v1014_v57, %v1008_v3  ;;  %v1019_v16 = vadd.f32 %v1018_v32, %v1012_v43  ;;  %v1028_v23 = vmul.f32 %v2494_v14, %v1027_v20  ;;  %v1032_v24 = vmul.f32 %v2494_v14, %v1031_v12  ;;  %v1084_v57 = vld [vmem:[#allocation11 + $0x90] sm:$0xff] }
  0xc3   : > { %v2543_v22 = vadd.f32 %v2507_v41, %v902_v10  ;;  %v963_v5 = vadd.f32 %v962_v50, %v956_v15  ;;  %v967_v39 = vadd.f32 %v966_v47, %v960_v26  ;;  %v1154_v28 = vperm.slane %v2437_v38, 2  ;;  %v1091_v15 = vld [vmem:[#allocation11 + $0x98] sm:$0xff] }
  0xc4   : > { %v1022_v2 = vadd.f32 %v1021_v0, %v1015_v1  ;;  %v1026_v48 = vadd.f32 %v1025_v60, %v1019_v16  ;;  %v1035_v20 = vmul.f32 %v2501_v42, %v1034_v45  ;;  %v1039_v58 = vmul.f32 %v2501_v42, %v1038_v6  ;;  %v1098_v16 = vld [vmem:[#allocation11 + $0xa0] sm:$0xff] }
  0xc5   : > { %1581 = vrcp.f32 %v2543_v22  ;;  %v913_v50 = vand.u32 2147483647, %v2543_v22  ;;  %v915_v47 = vand.u32 2147483648, %v2543_v22  ;;  %v1042_v63 = vmul.f32 %v2507_v41, %v1041_v52 }
  0xc6   : > { %v970_v49 = vadd.f32 %v969_v19, %v963_v5  ;;  %v974_v34 = vadd.f32 %v973_v33, %v967_v39  ;;  %v1029_v44 = vadd.f32 %v1028_v23, %v1022_v2  ;;  %v1033_v45 = vadd.f32 %v1032_v24, %v1026_v48  ;;  %v1105_v39 = vld [vmem:[#allocation11 + $0xa8] sm:$0xff] }
  0xc7   : > { %vm909_vm0 = vweird.f32 %v2543_v22  ;;  %v2561_v8 = vor.u32 1.1754944e-38, %v915_v47  ;;  %v987_v51 = vstv %s2524_s5  ;;  %v1046_v9 = vmul.f32 %v2507_v41, %v1045_v59  ;;  %v1112_v59 = vld [vmem:[#allocation11 + $0xb0] sm:$0xff]  ;;  %s1415_s5 = sshll.u32 %s1224_s27, 3 }
  0xc8   : > { %v978_v62 = vmul.f32 %v977_v13, %v970_v49  ;;  %v982_v52 = vmul.f32 %v981_v17, %v974_v34  ;;  %v1036_v19 = vadd.f32 %v1035_v20, %v1029_v44  ;;  %v1040_v33 = vadd.f32 %v1039_v58, %v1033_v45  ;;  %v1144_v44 = vld [vmem:[#allocation11 + $0xc0] sm:$0xff] }
  0xc9   : > { %v1067_v12 = vmul.f32 %v2455_v54, %v1066_v21  ;;  %v1071_v3 = vmul.f32 %v2455_v54, %v1070_v53  ;;  %v1074_v43 = vmul.f32 %v2460_v61, %v1073_v30  ;;  %v1078_v32 = vmul.f32 %v2460_v61, %v1077_v36 }
  0xca   : > { %vm2581_vm1 = vcmp.eq.f32.partialorder %v913_v50, 8.507059e+37  ;;  %v1043_v17 = vadd.f32 %v1042_v63, %v1036_v19  ;;  %v1047_v0 = vadd.f32 %v1046_v9, %v1040_v33  ;;  %v1060_v10 = vstv %s2540_s14  ;;  %v1119_v63 = vld [vmem:[#allocation11 + $0xb8] sm:$0xff]  ;;  %v1151_v9 = vld [vmem:[#allocation11 + $0xc8] sm:$0xff]  ;;  %v1158_v33 = vld [vmem:[#allocation11 + $0xd0] sm:$0xff]  ;;  %s1226_s14 = scalar_lea.hbm %s2746_s7, %s1415_s5 }
  0xcb   : > { %v1081_v21 = vmul.f32 %v2467_v46, %v1080_v31  ;;  %v1582_v30 = vpop.eup %1581  ;;  %v1075_v26 = vadd.f32 %v1074_v43, %v1067_v12  ;;  %v1079_v60 = vadd.f32 %v1078_v32, %v1071_v3  ;;  %v1085_v6 = vmul.f32 %v2467_v46, %v1084_v57  ;;  %s1229_s10 = sshll.u32 %s1226_s14, 4  ;;  %s1230_s10 = int_to_ptr.hbm [resolvable:$true] %s1229_s10 }
  0xcc   : > { %v1088_v1 = vmul.f32 %v2478_v7, %v1087_v25  ;;  %v905_v23 = vmul.f32 %v1582_v30, %v2543_v22  ;;  %v983_v24 = vadd.f32 %v982_v52, %v978_v62  ;;  %v1051_v5 = vmul.f32 %v1050_v29, %v1043_v17  ;;  %s1777_s17 = sshra.s32 %s1230_s10, 4  ;;  %s1778_s17 = int_to_ptr.hbm [resolvable:$true] %s1777_s17 }
  0xcd   : > { %v1055_v31 = vmul.f32 %v1054_v18, %v1047_v0  ;;  %v1082_v2 = vadd.f32 %v1081_v21, %v1075_v26  ;;  %v1086_v48 = vadd.f32 %v1085_v6, %v1079_v60  ;;  %v1092_v20 = vmul.f32 %v2478_v7, %v1091_v15  ;;  %v1165_v21 = vld [vmem:[#allocation11 + $0xd8] sm:$0xff]  ;;  %v1172_v6 = vld [vmem:[#allocation11 + $0xe0] sm:$0xff]  ;;  %s1779_s9 = scalar_lea.hbm %s1778_s17, 32  ;;  %p1784_p9 = scmp.lt.s32.totalorder %s1778_s17, %s2746_s7 }
  0xce   : > { %v1095_v58 = vmul.f32 %v2488_v4, %v1094_v27  ;;  %v906_v25 = vsub.f32 1.0, %v905_v23  ;;  %vm910_vm2 = vweird.f32 %v1582_v30  ;;  %v1099_v47 = vmul.f32 %v2488_v4, %v1098_v16  ;;  %v1179_v23 = vld [vmem:[#allocation11 + $0xe8] sm:$0xff]  ;;  %p1780_p1 = scmp.ne.s32.totalorder %s1778_s17, %s1779_s9  ;;  %p1785_p10 = scmp.lt.s32.totalorder %s1783_s12, %s1779_s9 }
  0xcf   : > { %v1056_v50 = vadd.f32 %v1055_v31, %v1051_v5  ;;  %v1089_v29 = vadd.f32 %v1088_v1, %v1082_v2  ;;  %v1093_v18 = vadd.f32 %v1092_v20, %v1086_v48  ;;  %v1102_v49 = vmul.f32 %v2494_v14, %v1101_v55  ;;  %vm2620_vm3 = vmor %vm909_vm0, %vm910_vm2 }
  0xd0   : > { %v1106_v34 = vmul.f32 %v2494_v14, %v1105_v39  ;;  %v907_v27 = vmul.f32 %v1582_v30, %v906_v25  ;;  %v1109_v45 = vmul.f32 %v2501_v42, %v1108_v56  ;;  %v1113_v53 = vmul.f32 %v2501_v42, %v1112_v59  ;;  %v1186_v59 = vld [vmem:[#allocation11 + $0xf0] sm:$0xff]  ;;  %p1781_p3 = pnand %p1780_p1, %p2062_p0  ;;  %p1786_p11 = por %p1785_p10, %p1784_p9 }
  0xd1   : > { %v1116_v36 = vmul.f32 %v2507_v41, %v1115_v40  ;;  %v1096_v62 = vadd.f32 %v1095_v58, %v1089_v29  ;;  %v1100_v52 = vadd.f32 %v1099_v47, %v1093_v18  ;;  %v1120_v56 = vmul.f32 %v2507_v41, %v1119_v63  ;;  %v1193_v18 = vld [vmem:[#allocation11 + $0xf8] sm:$0xff] }
  0xd2   : > { %v1124_v19 = vstv %s2579_s1  ;;  %v908_v57 = vadd.f32 %v1582_v30, %v907_v27  ;;  %v1141_v40 = vmul.f32 %v2455_v54, %v1140_v35  ;;  %v1145_v12 = vmul.f32 %v2455_v54, %v1144_v44  ;;  %s1213_s1 = scalar_lea.sflag [#allocation4], %s2091_s2  ;;  %p1782_p8 = pneg %p1781_p3 }
  0xd3   : > { %v1103_v22 = vadd.f32 %v1102_v49, %v1096_v62  ;;  %v1107_v3 = vadd.f32 %v1106_v34, %v1100_v52  ;;  %v1148_v43 = vmul.f32 %v2460_v61, %v1147_v11  ;;  %v1152_v32 = vmul.f32 %v2460_v61, %v1151_v9 }
  0xd4   : > { %v912_v35 = vsel %vm2620_vm3, %v1582_v30, %v908_v57  ;;  %v1155_v54 = vmul.f32 %v2467_v46, %v1154_v28  ;;  %v1159_v17 = vmul.f32 %v2467_v46, %v1158_v33  ;;  %v1161_v0 = vperm.slane %v2437_v38, 3  ;;  %p1787_p12 = pnand %p1786_p11, %p1782_p8 }
  0xd5   : > { %v2652_v11 = vsel %vm2581_vm1, %v2561_v8, %v912_v35  ;;  %v1110_v61 = vadd.f32 %v1109_v45, %v1103_v22  ;;  %v1114_v15 = vadd.f32 %v1113_v53, %v1107_v3  ;;  %v1149_v26 = vadd.f32 %v1148_v43, %v1141_v40 }
  0xd6   : > { %v984_v30 = vmul.f32 %v983_v24, %v2652_v11  ;;  %v1057_v28 = vmul.f32 %v1056_v50, %v2652_v11  ;;  %v1153_v60 = vadd.f32 %v1152_v32, %v1145_v12  ;;  %v1162_v46 = vmul.f32 %v2478_v7, %v1161_v0 }
  0xd7   : > { %v1117_v1 = vadd.f32 %v1116_v36, %v1110_v61  ;;  %v1121_v13 = vadd.f32 %v1120_v56, %v1114_v15  ;;  %v1156_v16 = vadd.f32 %v1155_v54, %v1149_v26  ;;  %v1166_v8 = vmul.f32 %v2478_v7, %v1165_v21 }
  0xd8   : > { %v988_v5 = vadd.f32 %v987_v51, %v984_v30  ;;  %v1061_v31 = vadd.f32 %v1060_v10, %v1057_v28  ;;  %v1160_v24 = vadd.f32 %v1159_v17, %v1153_v60  ;;  %v1168_v39 = vperm.slane %v2437_v38, 4 }
  0xd9   : > { %v1125_v2 = vmul.f32 %v1124_v19, %v1117_v1  ;;  %v1129_v48 = vmul.f32 %v1128_v37, %v1121_v13  ;;  %v1163_v20 = vadd.f32 %v1162_v46, %v1156_v16  ;;  %v1173_v58 = vmul.f32 %v2488_v4, %v1172_v6 }
  0xda   : > { %989 = vst [vmem:[%s2672_s13] sm:$0xff] %v988_v5  ;;  %v1167_v7 = vadd.f32 %v1166_v8, %v1160_v24  ;;  %v1169_v51 = vmul.f32 %v2488_v4, %v1168_v39  ;;  %v1175_v10 = vperm.slane %v2437_v38, 5  ;;  %v1180_v25 = vmul.f32 %v2494_v14, %v1179_v23 }
  0xdb   : > { %1407 = vst [vmem:[%s2672_s13 + $0x8] sm:$0xff] %v1061_v31  ;;  %v1130_v50 = vadd.f32 %v1129_v48, %v1125_v2  ;;  %v1134_v47 = vstv %s2635_s23  ;;  %v1182_v63 = vperm.slane %v2437_v38, 6  ;;  %v1189_v29 = vperm.slane %v2437_v38, 7 }
  0xdc   : > { %v1170_v49 = vadd.f32 %v1169_v51, %v1163_v20  ;;  %v1174_v34 = vadd.f32 %v1173_v58, %v1167_v7  ;;  %v1176_v44 = vmul.f32 %v2494_v14, %v1175_v10  ;;  %v1187_v4 = vmul.f32 %v2501_v42, %v1186_v59 }
  0xdd   : > { %v1131_v27 = vmul.f32 %v1130_v50, %v2652_v11  ;;  %v1183_v45 = vmul.f32 %v2501_v42, %v1182_v63  ;;  %v1190_v38 = vmul.f32 %v2507_v41, %v1189_v29  ;;  %v1194_v9 = vmul.f32 %v2507_v41, %v1193_v18 }
  0xde   : > { %v1177_v53 = vadd.f32 %v1176_v44, %v1170_v49  ;;  %v1181_v36 = vadd.f32 %v1180_v25, %v1174_v34  ;;  %v1198_v52 = vstv %s2665_s21  ;;  %v1202_v56 = vstv %s2668_s19 }
  0xdf   : > { %v1135_v55 = vadd.f32 %v1134_v47, %v1131_v27  ;;  %v1208_v37 = vstv %s1207_s4 }
  0xe0   : > { %v1184_v14 = vadd.f32 %v1183_v45, %v1177_v53  ;;  %v1188_v62 = vadd.f32 %v1187_v4, %v1181_v36 }
  0xe1   : > { %1409 = vst [vmem:[%s2672_s13 + $0x10] sm:$0xff] %v1135_v55 }
  0xe2   : > { %v1191_v19 = vadd.f32 %v1190_v38, %v1184_v14  ;;  %v1195_v42 = vadd.f32 %v1194_v9, %v1188_v62 }
  0xe4   : > { %v1199_v33 = vmul.f32 %v1198_v52, %v1191_v19  ;;  %v1203_v57 = vmul.f32 %v1202_v56, %v1195_v42 }
  0xe6   : > { %v1204_v41 = vadd.f32 %v1203_v57, %v1199_v33 }
  0xe8   : > { %v1205_v40 = vmul.f32 %v1204_v41, %v2652_v11 }
  0xea   : > { %v1209_v12 = vadd.f32 %v1208_v37, %v1205_v40 }
  0xec   : > { %1411 = vst [vmem:[%s2672_s13 + $0x18] sm:$0xff] %v1209_v12 }
  0xed   : > { %1790 = shalt.err (!%p1787_p12)
}
  0xee   : > { %s1888_s2 = smov 128   ;;  %s1889_s19 = smov 512  }
  0xef   : > { %s1890_s13 = smov 8  }
  0xf0   : > { %1446 = dma.vmem_to_hbm [thread:$0]  (%p2062_p0), %s1228_s11, 512, %s1230_s10, %s1213_s1, %s1888_s2, %s1889_s19, %s1890_s13  }
  0xf1 PF: > { %p1488_p13 = scmp.ge.s32.totalorder %s1877_s8, 2  ;;  %s1244_s20 = sand.u32 1, %s1849_s24  }
  0xf2   : > { %s1245_s3 = scalar_lea.sflag [#allocation4], %s1244_s20 }
  0xf3   : > { %p1472_p2 = pnand %p1488_p13, %p2069_p6 }
  0xf5   : > { %p1473_p4 = pneg %p1472_p2 }
  0xf7   : > { %1844 = dma.done.wait (%p1473_p4), %s1245_s3, 512  }
  0xf8   : > { %1846 = vsyncadd (%p1473_p4), %s1245_s3, 4294966784  ;;  %s27_s8 = sadd.s32 1, %s1877_s8   ;;  %s2782_s27 = sld [smem:[#allocation22_spill]] }
  0xf9   : > { %p24_p5 = scmp.ge.s32.totalorder %s27_s8, 18   ;;  %s2783_s29 = sld [smem:[#allocation23_spill]] }
  0xfa   : > { %s2784_s18 = sld [smem:[#allocation24_spill]]  ;;  %s2785_s24 = smov %s1853_s25 }
  0xfb   : > { %s2786_s25 = smov %s1857_s26  ;;  %s2787_s26 = smov %s2076_s22 }
  0xfc   : > { %s2788_s28 = smov %s1873_s30  ;;  %26 = sbr.rel (!%p24_p5) target bundleno = 18 (0x12), region = 162 }
 0x100   : > { %s2789_s30 = smov %s2784_s18 }
 0x101   :  { %1251 = vsyncpa [#allocation3], 1 }
 0x102   :  { %1253 = vsyncpa [#allocation3 + $0x1], 1 }
 0x103   :  { %1254 = vsyncpa [#allocation7], 1 }
 0x104   :  { %1255 = vsyncpa [#allocation10], 1 }
 0x105   :  { %1256 = vsyncpa [#allocation4], 1 }
 0x106   :  { %1258 = vsyncpa [#allocation4 + $0x1], 1 }
 0x107   :  { %1259 = vsyncpa [#allocation5], 1 }
 0x108   :  { %1261 = vsyncpa [#allocation5 + $0x1], 1 }
 0x109   :  { %1262 = vsyncpa [#allocation14], 1 }

</bundles_post_ra>
